<compile_context>
chip_gen: v5e
topology: v5e:2x2
jax: 0.10.0
libtpu: 0.0.40
codegen_flags: <defaults>
</compile_context>

<pallas_src>
import functools

import jax
import jax.numpy as jnp
from jax import lax
from jax.experimental import pallas as pl
from jax.experimental.pallas import tpu as pltpu

D_MODEL = 32
N_HEADS = 4
D_FF = 64
LN_EPS = 1e-6  # custom LayerNormalization eps (PyTorch nn.LayerNorm default is 1e-5)

# ---- packed-parameter layout (shared by wrapper packer and kernel) ----
_LANE_ALIGN = 128
_W_SEGS = ("wqk1", "wvo1", "wq2", "wk2", "wvo2", "wf1")
_BIAS_ROWS = ("bqk1", "bo1f", "bq2", "bk2", "bo2f", "bf1", "bf2",
              "g1", "be1", "g2", "be2", "g3", "be3")


def _w_off(name):
    return _LANE_ALIGN * _W_SEGS.index(name)


def _b_row(name):
    return _BIAS_ROWS.index(name)


def pack_params(params, n_heads=N_HEADS):
    """Pack all parameters into (w_slab [D,6*128], wf2 [d_ff,D], b_slab [16,128]).

    Runs ONCE at construction time (see make_decoder_layer); never on the
    per-call path.
    """
    D = params["wq1"].shape[0]
    dh = D // n_heads
    scale = 1.0 / (dh ** 0.5)

    def fold_vo(wv, wo):
        # per-head Wv_h @ Wo_h, laid out lane-dense -> [D, H*D]
        return jnp.concatenate(
            [wv[:, h * dh:(h + 1) * dh] @ wo[h * dh:(h + 1) * dh, :]
             for h in range(n_heads)], axis=1)

    w_segments = {
        # attention scale folded into Wq columns
        "wqk1": jnp.concatenate([params["wq1"] * scale, params["wk1"]], axis=1),
        "wvo1": fold_vo(params["wv1"], params["wo1"]),
        "wq2": params["wq2"] * scale,
        "wk2": params["wk2"],
        "wvo2": fold_vo(params["wv2"], params["wo2"]),
        "wf1": params["wf1"],
    }
    w_cols = []
    for name in _W_SEGS:
        seg = w_segments[name]
        assert seg.shape[0] == D and seg.shape[1] <= _LANE_ALIGN, (name, seg.shape)
        w_cols.append(jnp.pad(seg, ((0, 0), (0, _LANE_ALIGN - seg.shape[1]))))
    w_slab = jnp.concatenate(w_cols, axis=1).astype(jnp.float32)   # [D, 6*128]

    b_rows_map = {
        "bqk1": jnp.concatenate([params["bq1"] * scale, params["bk1"]], axis=1),
        "bo1f": params["bo1"] + params["bv1"] @ params["wo1"],   # bv@Wo folded into bo
        "bq2": params["bq2"] * scale,
        "bk2": params["bk2"],
        "bo2f": params["bo2"] + params["bv2"] @ params["wo2"],
        "bf1": params["bf1"],
        "bf2": params["bf2"],
        "g1": params["g1"], "be1": params["be1"],
        "g2": params["g2"], "be2": params["be2"],
        "g3": params["g3"], "be3": params["be3"],
    }
    b_rows = []
    for name in _BIAS_ROWS:
        row = b_rows_map[name]
        assert row.shape[0] == 1 and row.shape[1] <= _LANE_ALIGN, (name, row.shape)
        b_rows.append(jnp.pad(row, ((0, 0), (0, _LANE_ALIGN - row.shape[1]))))
    b_slab = jnp.concatenate(b_rows, axis=0)
    pad = (-b_slab.shape[0]) % 8
    b_slab = jnp.pad(b_slab, ((0, pad), (0, 0))).astype(jnp.float32)  # [16, 128]

    wf2 = params["wf2"].astype(jnp.float32)   # [d_ff, D], stored UNtransposed
    return w_slab, wf2, b_slab


def decoder_layer_kernel(x_ref, mem_ref, w_ref, wf2_ref, b_ref, o_ref, *,
                         batch, n_heads, s_tgt, s_src, d_model, d_ff):
    D = d_model
    dh = D // n_heads
    f32 = jnp.float32

    def wseg(name, width):
        off = _w_off(name)
        return w_ref[:, off:off + width]

    def brow(name, width):
        r = _b_row(name)
        return b_ref[r:r + 1, 0:width]

    def layer_norm(h, g, b):
        mu = jnp.mean(h, axis=-1, keepdims=True)
        c = h - mu
        var = jnp.mean(c * c, axis=-1, keepdims=True)
        return c * lax.rsqrt(var + LN_EPS) * g + b

    def softmax_rows(s):
        m = jnp.max(s, axis=-1, keepdims=True)
        p = jnp.exp(s - m)
        return p * pl.reciprocal(jnp.sum(p, axis=-1, keepdims=True), approx=True)

    def mha(q_mat, q_off, k_mat, k_off, vo_mat, bo, s_q, s_k):
        # TODO(synk): optional src_mask / tgt_mask (None in the reference
        # forward) are not applied.
        outs = []
        for b in range(batch):                 # static unroll over batch rows
            q_rows = slice(b * s_q, (b + 1) * s_q)
            k_rows = slice(b * s_k, (b + 1) * s_k)
            # One XLU transpose per batch (shared by all heads); heads then use
            # cheap sublane slices of kT instead of lane-lane contractions.
            kT = k_mat[k_rows, k_off:k_off + D].T            # [D, s_k]
            vo = vo_mat[k_rows, :]                           # [s_k, H*D] (Wo folded)
            acc = jnp.zeros((s_q, D), f32)
            for h in range(n_heads):           # static unroll over heads
                lo = h * dh
                q_h = q_mat[q_rows, q_off + lo:q_off + lo + dh]   # scale pre-folded
                s = jnp.dot(q_h, kT[lo:lo + dh, :], preferred_element_type=f32)
                p = softmax_rows(s)
                # head contribution already in model space (Wv@Wo fold)
                acc = acc + jnp.dot(p, vo[:, h * D:(h + 1) * D],
                                    preferred_element_type=f32)
            outs.append(acc)
        out = outs[0] if batch == 1 else jnp.concatenate(outs, axis=0)
        return out + bo

    x = x_ref[...].astype(f32)      # [batch*s_tgt, D]
    mem = mem_ref[...].astype(f32)  # [batch*s_src, D]

    # --- sublayer 1: self-attention (fused Q|K proj, Wo-folded V proj) + res + LN ---
    qk1 = (jnp.dot(x, wseg("wqk1", 2 * D), preferred_element_type=f32)
           + brow("bqk1", 2 * D))
    vo1 = jnp.dot(x, wseg("wvo1", n_heads * D), preferred_element_type=f32)
    sa = mha(qk1, 0, qk1, D, vo1, brow("bo1f", D), s_tgt, s_tgt)
    x = layer_norm(x + sa, brow("g1", D), brow("be1", D))

    # --- sublayer 2: encoder-decoder attention + residual + LayerNorm ---
    q2 = (jnp.dot(x, wseg("wq2", D), preferred_element_type=f32)
          + brow("bq2", D))
    k2 = (jnp.dot(mem, wseg("wk2", D), preferred_element_type=f32)
          + brow("bk2", D))
    vo2 = jnp.dot(mem, wseg("wvo2", n_heads * D), preferred_element_type=f32)
    ca = mha(q2, 0, k2, 0, vo2, brow("bo2f", D), s_tgt, s_src)
    x = layer_norm(x + ca, brow("g2", D), brow("be2", D))

    # --- sublayer 3: position-wise feed-forward + residual + LayerNorm ---
    h1 = jnp.maximum(
        jnp.dot(x, wseg("wf1", d_ff), preferred_element_type=f32)
        + brow("bf1", d_ff), 0.0)
    ff = jnp.dot(h1, wf2_ref[...], preferred_element_type=f32) + brow("bf2", D)
    x = layer_norm(x + ff, brow("g3", D), brow("be3", D))

    o_ref[...] = x.astype(o_ref.dtype)


def make_decoder_layer(params, *, n_heads=N_HEADS):
    """Pack parameters ONCE and return a jitted forward(x, memory)."""
    w_slab, wf2, b_slab = pack_params(params, n_heads)
    d_ff = wf2.shape[0]

    @jax.jit
    def forward(x, memory):
        B, s_tgt, d = x.shape
        _, s_src, _ = memory.shape
        kernel = functools.partial(
            decoder_layer_kernel,
            batch=B, n_heads=n_heads, s_tgt=s_tgt, s_src=s_src,
            d_model=d, d_ff=d_ff)
        vmem_spec = pl.BlockSpec(memory_space=pltpu.MemorySpace.VMEM)
        out_flat = pl.pallas_call(
            kernel,
            out_shape=jax.ShapeDtypeStruct((B * s_tgt, d), x.dtype),
            in_specs=[vmem_spec] * 5,
            out_specs=vmem_spec,
        )(x.reshape(B * s_tgt, d), memory.reshape(B * s_src, d),
          w_slab, wf2, b_slab)
        return out_flat.reshape(B, s_tgt, d)

    return forward


def init_params(key):
    ks = jax.random.split(key, 32)
    it = iter(range(32))

    def w(shape, scale=0.05):
        return (scale * jax.random.normal(ks[next(it)], shape)).astype(jnp.float32)

    p = {}
    for name in ["wq1", "wk1", "wv1", "wo1", "wq2", "wk2", "wv2", "wo2"]:
        p[name] = w((D_MODEL, D_MODEL))
    for name in ["bq1", "bk1", "bv1", "bo1", "bq2", "bk2", "bv2", "bo2"]:
        p[name] = w((1, D_MODEL), scale=0.01)
    p["wf1"] = w((D_MODEL, D_FF))
    p["bf1"] = w((1, D_FF), scale=0.01)
    p["wf2"] = w((D_FF, D_MODEL))
    p["bf2"] = w((1, D_MODEL), scale=0.01)
    for name in ["g1", "g2", "g3"]:
        p[name] = jnp.ones((1, D_MODEL), jnp.float32)
    for name in ["be1", "be2", "be3"]:
        p[name] = jnp.zeros((1, D_MODEL), jnp.float32)
    return p


def decoder_layer_reference(x, memory, params, n_heads=N_HEADS):
    """Pure-JAX reference of the PyTorch module (post-norm decoder layer)."""
    def ln(h, g, b):
        mu = jnp.mean(h, axis=-1, keepdims=True)
        var = jnp.mean((h - mu) ** 2, axis=-1, keepdims=True)
        return (h - mu) / jnp.sqrt(var + LN_EPS) * g + b

    def mha(q_in, kv_in, wq, bq, wk, bk, wv, bv, wo, bo):
        B, Sq, D = q_in.shape
        Sk = kv_in.shape[1]
        dh = D // n_heads
        q = (q_in @ wq + bq).reshape(B, Sq, n_heads, dh).transpose(0, 2, 1, 3)
        k = (kv_in @ wk + bk).reshape(B, Sk, n_heads, dh).transpose(0, 2, 1, 3)
        v = (kv_in @ wv + bv).reshape(B, Sk, n_heads, dh).transpose(0, 2, 1, 3)
        s = jnp.einsum("bhqd,bhkd->bhqk", q, k) / jnp.sqrt(jnp.float32(dh))
        p = jax.nn.softmax(s, axis=-1)
        o = jnp.einsum("bhqk,bhkd->bhqd", p, v).transpose(0, 2, 1, 3).reshape(B, Sq, D)
        return o @ wo + bo

    p = params
    h = ln(x + mha(x, x, p["wq1"], p["bq1"], p["wk1"], p["bk1"],
                   p["wv1"], p["bv1"], p["wo1"], p["bo1"]), p["g1"], p["be1"])
    h = ln(h + mha(h, memory, p["wq2"], p["bq2"], p["wk2"], p["bk2"],
                   p["wv2"], p["bv2"], p["wo2"], p["bo2"]), p["g2"], p["be2"])
    ff = jnp.maximum(h @ p["wf1"] + p["bf1"], 0.0) @ p["wf2"] + p["bf2"]
    return ln(h + ff, p["g3"], p["be3"])


if __name__ == "__main__":
    key = jax.random.PRNGKey(0)
    kx, km, kp = jax.random.split(key, 3)

    B, S_TGT, S_SRC = 2, 8, 16
    x = jax.random.normal(kx, (B, S_TGT, D_MODEL), jnp.float32)
    memory = jax.random.normal(km, (B, S_SRC, D_MODEL), jnp.float32)
    params = init_params(kp)

    # Parameters are packed exactly once here; subsequent calls reuse the slabs.
    forward = make_decoder_layer(params)
    out = jax.block_until_ready(forward(x, memory))
    out = jax.block_until_ready(forward(x, memory))   # cached-pack / compiled path

    assert out.shape == (B, S_TGT, D_MODEL), out.shape
    assert bool(jnp.all(jnp.isfinite(out)))

    ref = decoder_layer_reference(x, memory, params)
    max_err = float(jnp.max(jnp.abs(out - ref)))
    assert max_err < 1e-2, f"max abs error vs reference: {max_err}"

    print("KERNEL_OK")
</pallas_src>

<mosaic_0001>
module attributes {stable_mosaic.version = 11 : i64} {
  func.func @decoder_layer_kernel(%arg0: memref<16x32xf32, #tpu.memory_space<vmem>>, %arg1: memref<32x32xf32, #tpu.memory_space<vmem>>, %arg2: memref<32x768xf32, #tpu.memory_space<vmem>>, %arg3: memref<64x32xf32, #tpu.memory_space<vmem>>, %arg4: memref<16x128xf32, #tpu.memory_space<vmem>>, %arg5: memref<16x32xf32, #tpu.memory_space<vmem>>) attributes {dimension_semantics = [], scalar_prefetch = 0 : i64, scratch_operands = 0 : i64, tpu.core_type = #tpu.core_type<tc>} {
    %c0 = arith.constant 0 : index
    %c0_0 = arith.constant 0 : index
    %0 = vector.load %arg0[%c0, %c0_0] : memref<16x32xf32, #tpu.memory_space<vmem>>, vector<16x32xf32>
    %c0_1 = arith.constant 0 : index
    %c0_2 = arith.constant 0 : index
    %1 = vector.load %arg1[%c0_1, %c0_2] : memref<32x32xf32, #tpu.memory_space<vmem>>, vector<32x32xf32>
    %c0_3 = arith.constant 0 : index
    %c0_4 = arith.constant 0 : index
    %2 = vector.load %arg2[%c0_3, %c0_4] : memref<32x768xf32, #tpu.memory_space<vmem>>, vector<32x64xf32>
    %cst = arith.constant dense<0.000000e+00> : vector<16x64xf32>
    %3 = tpu.matmul %0, %2, %cst {dimension_numbers = #tpu.dot_dimension_numbers<[1], [0], [0], [1], [0, 0, 1, 1], [], []>} : vector<16x32xf32>, vector<32x64xf32>, vector<16x64xf32> -> vector<16x64xf32>
    %c0_5 = arith.constant 0 : index
    %c0_6 = arith.constant 0 : index
    %4 = vector.load %arg4[%c0_5, %c0_6] : memref<16x128xf32, #tpu.memory_space<vmem>>, vector<1x64xf32>
    %5 = vector.broadcast %4 : vector<1x64xf32> to vector<16x64xf32>
    %6 = arith.addf %3, %5 : vector<16x64xf32>
    %c0_7 = arith.constant 0 : index
    %c128 = arith.constant 128 : index
    %7 = vector.load %arg2[%c0_7, %c128] : memref<32x768xf32, #tpu.memory_space<vmem>>, vector<32x128xf32>
    %cst_8 = arith.constant dense<0.000000e+00> : vector<16x128xf32>
    %8 = tpu.matmul %0, %7, %cst_8 {dimension_numbers = #tpu.dot_dimension_numbers<[1], [0], [0], [1], [0, 0, 1, 1], [], []>} : vector<16x32xf32>, vector<32x128xf32>, vector<16x128xf32> -> vector<16x128xf32>
    %c1 = arith.constant 1 : index
    %c0_9 = arith.constant 0 : index
    %9 = vector.load %arg4[%c1, %c0_9] : memref<16x128xf32, #tpu.memory_space<vmem>>, vector<1x32xf32>
    %10 = vector.extract_strided_slice %6 {offsets = [0, 32], sizes = [8, 32], strides = [1, 1]} : vector<16x64xf32> to vector<8x32xf32>
    %11 = tpu.transpose %10, [1, 0] : vector<8x32xf32> -> vector<32x8xf32>
    %12 = vector.extract_strided_slice %8 {offsets = [0, 0], sizes = [8, 128], strides = [1, 1]} : vector<16x128xf32> to vector<8x128xf32>
    %cst_10 = arith.constant 0.000000e+00 : f32
    %13 = vector.broadcast %cst_10 : f32 to vector<8x32xf32>
    %14 = vector.extract_strided_slice %6 {offsets = [0, 0], sizes = [8, 8], strides = [1, 1]} : vector<16x64xf32> to vector<8x8xf32>
    %15 = vector.extract_strided_slice %11 {offsets = [0, 0], sizes = [8, 8], strides = [1, 1]} : vector<32x8xf32> to vector<8x8xf32>
    %cst_11 = arith.constant dense<0.000000e+00> : vector<8x8xf32>
    %16 = tpu.matmul %14, %15, %cst_11 {dimension_numbers = #tpu.dot_dimension_numbers<[1], [0], [0], [1], [0, 0, 1, 1], [], []>} : vector<8x8xf32>, vector<8x8xf32>, vector<8x8xf32> -> vector<8x8xf32>
    %cst_12 = arith.constant dense<0xFF800000> : vector<8xf32>
    %17 = vector.multi_reduction <maximumf>, %16, %cst_12 [1] : vector<8x8xf32> to vector<8xf32>
    %18 = vector.shape_cast %17 : vector<8xf32> to vector<8x1xf32>
    %19 = vector.broadcast %18 : vector<8x1xf32> to vector<8x8xf32>
    %20 = arith.subf %16, %19 : vector<8x8xf32>
    %21 = math.exp %20 : vector<8x8xf32>
    %cst_13 = arith.constant dense<0.000000e+00> : vector<8xf32>
    %22 = vector.multi_reduction <add>, %21, %cst_13 [1] : vector<8x8xf32> to vector<8xf32>
    %23 = vector.shape_cast %22 : vector<8xf32> to vector<8x1xf32>
    %24 = tpu.reciprocal %23 {approx = true} : vector<8x1xf32> -> vector<8x1xf32>
    %25 = vector.broadcast %24 : vector<8x1xf32> to vector<8x8xf32>
    %26 = arith.mulf %21, %25 : vector<8x8xf32>
    %27 = vector.extract_strided_slice %12 {offsets = [0, 0], sizes = [8, 32], strides = [1, 1]} : vector<8x128xf32> to vector<8x32xf32>
    %cst_14 = arith.constant dense<0.000000e+00> : vector<8x32xf32>
    %28 = tpu.matmul %26, %27, %cst_14 {dimension_numbers = #tpu.dot_dimension_numbers<[1], [0], [0], [1], [0, 0, 1, 1], [], []>} : vector<8x8xf32>, vector<8x32xf32>, vector<8x32xf32> -> vector<8x32xf32>
    %29 = arith.addf %13, %28 : vector<8x32xf32>
    %30 = vector.extract_strided_slice %6 {offsets = [0, 8], sizes = [8, 8], strides = [1, 1]} : vector<16x64xf32> to vector<8x8xf32>
    %31 = vector.extract_strided_slice %11 {offsets = [8, 0], sizes = [8, 8], strides = [1, 1]} : vector<32x8xf32> to vector<8x8xf32>
    %cst_15 = arith.constant dense<0.000000e+00> : vector<8x8xf32>
    %32 = tpu.matmul %30, %31, %cst_15 {dimension_numbers = #tpu.dot_dimension_numbers<[1], [0], [0], [1], [0, 0, 1, 1], [], []>} : vector<8x8xf32>, vector<8x8xf32>, vector<8x8xf32> -> vector<8x8xf32>
    %cst_16 = arith.constant dense<0xFF800000> : vector<8xf32>
    %33 = vector.multi_reduction <maximumf>, %32, %cst_16 [1] : vector<8x8xf32> to vector<8xf32>
    %34 = vector.shape_cast %33 : vector<8xf32> to vector<8x1xf32>
    %35 = vector.broadcast %34 : vector<8x1xf32> to vector<8x8xf32>
    %36 = arith.subf %32, %35 : vector<8x8xf32>
    %37 = math.exp %36 : vector<8x8xf32>
    %cst_17 = arith.constant dense<0.000000e+00> : vector<8xf32>
    %38 = vector.multi_reduction <add>, %37, %cst_17 [1] : vector<8x8xf32> to vector<8xf32>
    %39 = vector.shape_cast %38 : vector<8xf32> to vector<8x1xf32>
    %40 = tpu.reciprocal %39 {approx = true} : vector<8x1xf32> -> vector<8x1xf32>
    %41 = vector.broadcast %40 : vector<8x1xf32> to vector<8x8xf32>
    %42 = arith.mulf %37, %41 : vector<8x8xf32>
    %43 = vector.extract_strided_slice %12 {offsets = [0, 32], sizes = [8, 32], strides = [1, 1]} : vector<8x128xf32> to vector<8x32xf32>
    %cst_18 = arith.constant dense<0.000000e+00> : vector<8x32xf32>
    %44 = tpu.matmul %42, %43, %cst_18 {dimension_numbers = #tpu.dot_dimension_numbers<[1], [0], [0], [1], [0, 0, 1, 1], [], []>} : vector<8x8xf32>, vector<8x32xf32>, vector<8x32xf32> -> vector<8x32xf32>
    %45 = arith.addf %29, %44 : vector<8x32xf32>
    %46 = vector.extract_strided_slice %6 {offsets = [0, 16], sizes = [8, 8], strides = [1, 1]} : vector<16x64xf32> to vector<8x8xf32>
    %47 = vector.extract_strided_slice %11 {offsets = [16, 0], sizes = [8, 8], strides = [1, 1]} : vector<32x8xf32> to vector<8x8xf32>
    %cst_19 = arith.constant dense<0.000000e+00> : vector<8x8xf32>
    %48 = tpu.matmul %46, %47, %cst_19 {dimension_numbers = #tpu.dot_dimension_numbers<[1], [0], [0], [1], [0, 0, 1, 1], [], []>} : vector<8x8xf32>, vector<8x8xf32>, vector<8x8xf32> -> vector<8x8xf32>
    %cst_20 = arith.constant dense<0xFF800000> : vector<8xf32>
    %49 = vector.multi_reduction <maximumf>, %48, %cst_20 [1] : vector<8x8xf32> to vector<8xf32>
    %50 = vector.shape_cast %49 : vector<8xf32> to vector<8x1xf32>
    %51 = vector.broadcast %50 : vector<8x1xf32> to vector<8x8xf32>
    %52 = arith.subf %48, %51 : vector<8x8xf32>
    %53 = math.exp %52 : vector<8x8xf32>
    %cst_21 = arith.constant dense<0.000000e+00> : vector<8xf32>
    %54 = vector.multi_reduction <add>, %53, %cst_21 [1] : vector<8x8xf32> to vector<8xf32>
    %55 = vector.shape_cast %54 : vector<8xf32> to vector<8x1xf32>
    %56 = tpu.reciprocal %55 {approx = true} : vector<8x1xf32> -> vector<8x1xf32>
    %57 = vector.broadcast %56 : vector<8x1xf32> to vector<8x8xf32>
    %58 = arith.mulf %53, %57 : vector<8x8xf32>
    %59 = vector.extract_strided_slice %12 {offsets = [0, 64], sizes = [8, 32], strides = [1, 1]} : vector<8x128xf32> to vector<8x32xf32>
    %cst_22 = arith.constant dense<0.000000e+00> : vector<8x32xf32>
    %60 = tpu.matmul %58, %59, %cst_22 {dimension_numbers = #tpu.dot_dimension_numbers<[1], [0], [0], [1], [0, 0, 1, 1], [], []>} : vector<8x8xf32>, vector<8x32xf32>, vector<8x32xf32> -> vector<8x32xf32>
    %61 = arith.addf %45, %60 : vector<8x32xf32>
    %62 = vector.extract_strided_slice %6 {offsets = [0, 24], sizes = [8, 8], strides = [1, 1]} : vector<16x64xf32> to vector<8x8xf32>
    %63 = vector.extract_strided_slice %11 {offsets = [24, 0], sizes = [8, 8], strides = [1, 1]} : vector<32x8xf32> to vector<8x8xf32>
    %cst_23 = arith.constant dense<0.000000e+00> : vector<8x8xf32>
    %64 = tpu.matmul %62, %63, %cst_23 {dimension_numbers = #tpu.dot_dimension_numbers<[1], [0], [0], [1], [0, 0, 1, 1], [], []>} : vector<8x8xf32>, vector<8x8xf32>, vector<8x8xf32> -> vector<8x8xf32>
    %cst_24 = arith.constant dense<0xFF800000> : vector<8xf32>
    %65 = vector.multi_reduction <maximumf>, %64, %cst_24 [1] : vector<8x8xf32> to vector<8xf32>
    %66 = vector.shape_cast %65 : vector<8xf32> to vector<8x1xf32>
    %67 = vector.broadcast %66 : vector<8x1xf32> to vector<8x8xf32>
    %68 = arith.subf %64, %67 : vector<8x8xf32>
    %69 = math.exp %68 : vector<8x8xf32>
    %cst_25 = arith.constant dense<0.000000e+00> : vector<8xf32>
    %70 = vector.multi_reduction <add>, %69, %cst_25 [1] : vector<8x8xf32> to vector<8xf32>
    %71 = vector.shape_cast %70 : vector<8xf32> to vector<8x1xf32>
    %72 = tpu.reciprocal %71 {approx = true} : vector<8x1xf32> -> vector<8x1xf32>
    %73 = vector.broadcast %72 : vector<8x1xf32> to vector<8x8xf32>
    %74 = arith.mulf %69, %73 : vector<8x8xf32>
    %75 = vector.extract_strided_slice %12 {offsets = [0, 96], sizes = [8, 32], strides = [1, 1]} : vector<8x128xf32> to vector<8x32xf32>
    %cst_26 = arith.constant dense<0.000000e+00> : vector<8x32xf32>
    %76 = tpu.matmul %74, %75, %cst_26 {dimension_numbers = #tpu.dot_dimension_numbers<[1], [0], [0], [1], [0, 0, 1, 1], [], []>} : vector<8x8xf32>, vector<8x32xf32>, vector<8x32xf32> -> vector<8x32xf32>
    %77 = arith.addf %61, %76 : vector<8x32xf32>
    %78 = vector.extract_strided_slice %6 {offsets = [8, 32], sizes = [8, 32], strides = [1, 1]} : vector<16x64xf32> to vector<8x32xf32>
    %79 = tpu.transpose %78, [1, 0] : vector<8x32xf32> -> vector<32x8xf32>
    %80 = vector.extract_strided_slice %8 {offsets = [8, 0], sizes = [8, 128], strides = [1, 1]} : vector<16x128xf32> to vector<8x128xf32>
    %cst_27 = arith.constant 0.000000e+00 : f32
    %81 = vector.broadcast %cst_27 : f32 to vector<8x32xf32>
    %82 = vector.extract_strided_slice %6 {offsets = [8, 0], sizes = [8, 8], strides = [1, 1]} : vector<16x64xf32> to vector<8x8xf32>
    %83 = vector.extract_strided_slice %79 {offsets = [0, 0], sizes = [8, 8], strides = [1, 1]} : vector<32x8xf32> to vector<8x8xf32>
    %cst_28 = arith.constant dense<0.000000e+00> : vector<8x8xf32>
    %84 = tpu.matmul %82, %83, %cst_28 {dimension_numbers = #tpu.dot_dimension_numbers<[1], [0], [0], [1], [0, 0, 1, 1], [], []>} : vector<8x8xf32>, vector<8x8xf32>, vector<8x8xf32> -> vector<8x8xf32>
    %cst_29 = arith.constant dense<0xFF800000> : vector<8xf32>
    %85 = vector.multi_reduction <maximumf>, %84, %cst_29 [1] : vector<8x8xf32> to vector<8xf32>
    %86 = vector.shape_cast %85 : vector<8xf32> to vector<8x1xf32>
    %87 = vector.broadcast %86 : vector<8x1xf32> to vector<8x8xf32>
    %88 = arith.subf %84, %87 : vector<8x8xf32>
    %89 = math.exp %88 : vector<8x8xf32>
    %cst_30 = arith.constant dense<0.000000e+00> : vector<8xf32>
    %90 = vector.multi_reduction <add>, %89, %cst_30 [1] : vector<8x8xf32> to vector<8xf32>
    %91 = vector.shape_cast %90 : vector<8xf32> to vector<8x1xf32>
    %92 = tpu.reciprocal %91 {approx = true} : vector<8x1xf32> -> vector<8x1xf32>
    %93 = vector.broadcast %92 : vector<8x1xf32> to vector<8x8xf32>
    %94 = arith.mulf %89, %93 : vector<8x8xf32>
    %95 = vector.extract_strided_slice %80 {offsets = [0, 0], sizes = [8, 32], strides = [1, 1]} : vector<8x128xf32> to vector<8x32xf32>
    %cst_31 = arith.constant dense<0.000000e+00> : vector<8x32xf32>
    %96 = tpu.matmul %94, %95, %cst_31 {dimension_numbers = #tpu.dot_dimension_numbers<[1], [0], [0], [1], [0, 0, 1, 1], [], []>} : vector<8x8xf32>, vector<8x32xf32>, vector<8x32xf32> -> vector<8x32xf32>
    %97 = arith.addf %81, %96 : vector<8x32xf32>
    %98 = vector.extract_strided_slice %6 {offsets = [8, 8], sizes = [8, 8], strides = [1, 1]} : vector<16x64xf32> to vector<8x8xf32>
    %99 = vector.extract_strided_slice %79 {offsets = [8, 0], sizes = [8, 8], strides = [1, 1]} : vector<32x8xf32> to vector<8x8xf32>
    %cst_32 = arith.constant dense<0.000000e+00> : vector<8x8xf32>
    %100 = tpu.matmul %98, %99, %cst_32 {dimension_numbers = #tpu.dot_dimension_numbers<[1], [0], [0], [1], [0, 0, 1, 1], [], []>} : vector<8x8xf32>, vector<8x8xf32>, vector<8x8xf32> -> vector<8x8xf32>
    %cst_33 = arith.constant dense<0xFF800000> : vector<8xf32>
    %101 = vector.multi_reduction <maximumf>, %100, %cst_33 [1] : vector<8x8xf32> to vector<8xf32>
    %102 = vector.shape_cast %101 : vector<8xf32> to vector<8x1xf32>
    %103 = vector.broadcast %102 : vector<8x1xf32> to vector<8x8xf32>
    %104 = arith.subf %100, %103 : vector<8x8xf32>
    %105 = math.exp %104 : vector<8x8xf32>
    %cst_34 = arith.constant dense<0.000000e+00> : vector<8xf32>
    %106 = vector.multi_reduction <add>, %105, %cst_34 [1] : vector<8x8xf32> to vector<8xf32>
    %107 = vector.shape_cast %106 : vector<8xf32> to vector<8x1xf32>
    %108 = tpu.reciprocal %107 {approx = true} : vector<8x1xf32> -> vector<8x1xf32>
    %109 = vector.broadcast %108 : vector<8x1xf32> to vector<8x8xf32>
    %110 = arith.mulf %105, %109 : vector<8x8xf32>
    %111 = vector.extract_strided_slice %80 {offsets = [0, 32], sizes = [8, 32], strides = [1, 1]} : vector<8x128xf32> to vector<8x32xf32>
    %cst_35 = arith.constant dense<0.000000e+00> : vector<8x32xf32>
    %112 = tpu.matmul %110, %111, %cst_35 {dimension_numbers = #tpu.dot_dimension_numbers<[1], [0], [0], [1], [0, 0, 1, 1], [], []>} : vector<8x8xf32>, vector<8x32xf32>, vector<8x32xf32> -> vector<8x32xf32>
    %113 = arith.addf %97, %112 : vector<8x32xf32>
    %114 = vector.extract_strided_slice %6 {offsets = [8, 16], sizes = [8, 8], strides = [1, 1]} : vector<16x64xf32> to vector<8x8xf32>
    %115 = vector.extract_strided_slice %79 {offsets = [16, 0], sizes = [8, 8], strides = [1, 1]} : vector<32x8xf32> to vector<8x8xf32>
    %cst_36 = arith.constant dense<0.000000e+00> : vector<8x8xf32>
    %116 = tpu.matmul %114, %115, %cst_36 {dimension_numbers = #tpu.dot_dimension_numbers<[1], [0], [0], [1], [0, 0, 1, 1], [], []>} : vector<8x8xf32>, vector<8x8xf32>, vector<8x8xf32> -> vector<8x8xf32>
    %cst_37 = arith.constant dense<0xFF800000> : vector<8xf32>
    %117 = vector.multi_reduction <maximumf>, %116, %cst_37 [1] : vector<8x8xf32> to vector<8xf32>
    %118 = vector.shape_cast %117 : vector<8xf32> to vector<8x1xf32>
    %119 = vector.broadcast %118 : vector<8x1xf32> to vector<8x8xf32>
    %120 = arith.subf %116, %119 : vector<8x8xf32>
    %121 = math.exp %120 : vector<8x8xf32>
    %cst_38 = arith.constant dense<0.000000e+00> : vector<8xf32>
    %122 = vector.multi_reduction <add>, %121, %cst_38 [1] : vector<8x8xf32> to vector<8xf32>
    %123 = vector.shape_cast %122 : vector<8xf32> to vector<8x1xf32>
    %124 = tpu.reciprocal %123 {approx = true} : vector<8x1xf32> -> vector<8x1xf32>
    %125 = vector.broadcast %124 : vector<8x1xf32> to vector<8x8xf32>
    %126 = arith.mulf %121, %125 : vector<8x8xf32>
    %127 = vector.extract_strided_slice %80 {offsets = [0, 64], sizes = [8, 32], strides = [1, 1]} : vector<8x128xf32> to vector<8x32xf32>
    %cst_39 = arith.constant dense<0.000000e+00> : vector<8x32xf32>
    %128 = tpu.matmul %126, %127, %cst_39 {dimension_numbers = #tpu.dot_dimension_numbers<[1], [0], [0], [1], [0, 0, 1, 1], [], []>} : vector<8x8xf32>, vector<8x32xf32>, vector<8x32xf32> -> vector<8x32xf32>
    %129 = arith.addf %113, %128 : vector<8x32xf32>
    %130 = vector.extract_strided_slice %6 {offsets = [8, 24], sizes = [8, 8], strides = [1, 1]} : vector<16x64xf32> to vector<8x8xf32>
    %131 = vector.extract_strided_slice %79 {offsets = [24, 0], sizes = [8, 8], strides = [1, 1]} : vector<32x8xf32> to vector<8x8xf32>
    %cst_40 = arith.constant dense<0.000000e+00> : vector<8x8xf32>
    %132 = tpu.matmul %130, %131, %cst_40 {dimension_numbers = #tpu.dot_dimension_numbers<[1], [0], [0], [1], [0, 0, 1, 1], [], []>} : vector<8x8xf32>, vector<8x8xf32>, vector<8x8xf32> -> vector<8x8xf32>
    %cst_41 = arith.constant dense<0xFF800000> : vector<8xf32>
    %133 = vector.multi_reduction <maximumf>, %132, %cst_41 [1] : vector<8x8xf32> to vector<8xf32>
    %134 = vector.shape_cast %133 : vector<8xf32> to vector<8x1xf32>
    %135 = vector.broadcast %134 : vector<8x1xf32> to vector<8x8xf32>
    %136 = arith.subf %132, %135 : vector<8x8xf32>
    %137 = math.exp %136 : vector<8x8xf32>
    %cst_42 = arith.constant dense<0.000000e+00> : vector<8xf32>
    %138 = vector.multi_reduction <add>, %137, %cst_42 [1] : vector<8x8xf32> to vector<8xf32>
    %139 = vector.shape_cast %138 : vector<8xf32> to vector<8x1xf32>
    %140 = tpu.reciprocal %139 {approx = true} : vector<8x1xf32> -> vector<8x1xf32>
    %141 = vector.broadcast %140 : vector<8x1xf32> to vector<8x8xf32>
    %142 = arith.mulf %137, %141 : vector<8x8xf32>
    %143 = vector.extract_strided_slice %80 {offsets = [0, 96], sizes = [8, 32], strides = [1, 1]} : vector<8x128xf32> to vector<8x32xf32>
    %cst_43 = arith.constant dense<0.000000e+00> : vector<8x32xf32>
    %144 = tpu.matmul %142, %143, %cst_43 {dimension_numbers = #tpu.dot_dimension_numbers<[1], [0], [0], [1], [0, 0, 1, 1], [], []>} : vector<8x8xf32>, vector<8x32xf32>, vector<8x32xf32> -> vector<8x32xf32>
    %145 = arith.addf %129, %144 : vector<8x32xf32>
    %146 = tpu.concatenate %77, %145 in 0 : vector<8x32xf32>, vector<8x32xf32> -> vector<16x32xf32>
    %147 = vector.broadcast %9 : vector<1x32xf32> to vector<16x32xf32>
    %148 = arith.addf %146, %147 : vector<16x32xf32>
    %149 = arith.addf %0, %148 : vector<16x32xf32>
    %c7 = arith.constant 7 : index
    %c0_44 = arith.constant 0 : index
    %150 = vector.load %arg4[%c7, %c0_44] : memref<16x128xf32, #tpu.memory_space<vmem>>, vector<1x32xf32>
    %c8 = arith.constant 8 : index
    %c0_45 = arith.constant 0 : index
    %151 = vector.load %arg4[%c8, %c0_45] : memref<16x128xf32, #tpu.memory_space<vmem>>, vector<1x32xf32>
    %cst_46 = arith.constant dense<0.000000e+00> : vector<16xf32>
    %152 = vector.multi_reduction <add>, %149, %cst_46 [1] : vector<16x32xf32> to vector<16xf32>
    %153 = vector.shape_cast %152 : vector<16xf32> to vector<16x1xf32>
    %cst_47 = arith.constant 3.200000e+01 : f32
    %154 = vector.broadcast %cst_47 : f32 to vector<16x1xf32>
    %155 = arith.divf %153, %154 : vector<16x1xf32>
    %156 = vector.broadcast %155 : vector<16x1xf32> to vector<16x32xf32>
    %157 = arith.subf %149, %156 : vector<16x32xf32>
    %158 = arith.mulf %157, %157 : vector<16x32xf32>
    %cst_48 = arith.constant dense<0.000000e+00> : vector<16xf32>
    %159 = vector.multi_reduction <add>, %158, %cst_48 [1] : vector<16x32xf32> to vector<16xf32>
    %160 = vector.shape_cast %159 : vector<16xf32> to vector<16x1xf32>
    %cst_49 = arith.constant 3.200000e+01 : f32
    %161 = vector.broadcast %cst_49 : f32 to vector<16x1xf32>
    %162 = arith.divf %160, %161 : vector<16x1xf32>
    %cst_50 = arith.constant 9.99999997E-7 : f32
    %163 = vector.broadcast %cst_50 : f32 to vector<16x1xf32>
    %164 = arith.addf %162, %163 : vector<16x1xf32>
    %165 = math.rsqrt %164 : vector<16x1xf32>
    %166 = vector.broadcast %165 : vector<16x1xf32> to vector<16x32xf32>
    %167 = arith.mulf %157, %166 : vector<16x32xf32>
    %168 = vector.broadcast %150 : vector<1x32xf32> to vector<16x32xf32>
    %169 = arith.mulf %167, %168 : vector<16x32xf32>
    %170 = vector.broadcast %151 : vector<1x32xf32> to vector<16x32xf32>
    %171 = arith.addf %169, %170 : vector<16x32xf32>
    %c0_51 = arith.constant 0 : index
    %c256 = arith.constant 256 : index
    %172 = vector.load %arg2[%c0_51, %c256] : memref<32x768xf32, #tpu.memory_space<vmem>>, vector<32x32xf32>
    %cst_52 = arith.constant dense<0.000000e+00> : vector<16x32xf32>
    %173 = tpu.matmul %171, %172, %cst_52 {dimension_numbers = #tpu.dot_dimension_numbers<[1], [0], [0], [1], [0, 0, 1, 1], [], []>} : vector<16x32xf32>, vector<32x32xf32>, vector<16x32xf32> -> vector<16x32xf32>
    %c2 = arith.constant 2 : index
    %c0_53 = arith.constant 0 : index
    %174 = vector.load %arg4[%c2, %c0_53] : memref<16x128xf32, #tpu.memory_space<vmem>>, vector<1x32xf32>
    %175 = vector.broadcast %174 : vector<1x32xf32> to vector<16x32xf32>
    %176 = arith.addf %173, %175 : vector<16x32xf32>
    %c0_54 = arith.constant 0 : index
    %c384 = arith.constant 384 : index
    %177 = vector.load %arg2[%c0_54, %c384] : memref<32x768xf32, #tpu.memory_space<vmem>>, vector<32x32xf32>
    %cst_55 = arith.constant dense<0.000000e+00> : vector<32x32xf32>
    %178 = tpu.matmul %1, %177, %cst_55 {dimension_numbers = #tpu.dot_dimension_numbers<[1], [0], [0], [1], [0, 0, 1, 1], [], []>} : vector<32x32xf32>, vector<32x32xf32>, vector<32x32xf32> -> vector<32x32xf32>
    %c3 = arith.constant 3 : index
    %c0_56 = arith.constant 0 : index
    %179 = vector.load %arg4[%c3, %c0_56] : memref<16x128xf32, #tpu.memory_space<vmem>>, vector<1x32xf32>
    %180 = vector.broadcast %179 : vector<1x32xf32> to vector<32x32xf32>
    %181 = arith.addf %178, %180 : vector<32x32xf32>
    %c0_57 = arith.constant 0 : index
    %c512 = arith.constant 512 : index
    %182 = vector.load %arg2[%c0_57, %c512] : memref<32x768xf32, #tpu.memory_space<vmem>>, vector<32x128xf32>
    %cst_58 = arith.constant dense<0.000000e+00> : vector<32x128xf32>
    %183 = tpu.matmul %1, %182, %cst_58 {dimension_numbers = #tpu.dot_dimension_numbers<[1], [0], [0], [1], [0, 0, 1, 1], [], []>} : vector<32x32xf32>, vector<32x128xf32>, vector<32x128xf32> -> vector<32x128xf32>
    %c4 = arith.constant 4 : index
    %c0_59 = arith.constant 0 : index
    %184 = vector.load %arg4[%c4, %c0_59] : memref<16x128xf32, #tpu.memory_space<vmem>>, vector<1x32xf32>
    %185 = vector.extract_strided_slice %181 {offsets = [0, 0], sizes = [16, 32], strides = [1, 1]} : vector<32x32xf32> to vector<16x32xf32>
    %186 = tpu.transpose %185, [1, 0] : vector<16x32xf32> -> vector<32x16xf32>
    %187 = vector.extract_strided_slice %183 {offsets = [0, 0], sizes = [16, 128], strides = [1, 1]} : vector<32x128xf32> to vector<16x128xf32>
    %cst_60 = arith.constant 0.000000e+00 : f32
    %188 = vector.broadcast %cst_60 : f32 to vector<8x32xf32>
    %189 = vector.extract_strided_slice %176 {offsets = [0, 0], sizes = [8, 8], strides = [1, 1]} : vector<16x32xf32> to vector<8x8xf32>
    %190 = vector.extract_strided_slice %186 {offsets = [0, 0], sizes = [8, 16], strides = [1, 1]} : vector<32x16xf32> to vector<8x16xf32>
    %cst_61 = arith.constant dense<0.000000e+00> : vector<8x16xf32>
    %191 = tpu.matmul %189, %190, %cst_61 {dimension_numbers = #tpu.dot_dimension_numbers<[1], [0], [0], [1], [0, 0, 1, 1], [], []>} : vector<8x8xf32>, vector<8x16xf32>, vector<8x16xf32> -> vector<8x16xf32>
    %cst_62 = arith.constant dense<0xFF800000> : vector<8xf32>
    %192 = vector.multi_reduction <maximumf>, %191, %cst_62 [1] : vector<8x16xf32> to vector<8xf32>
    %193 = vector.shape_cast %192 : vector<8xf32> to vector<8x1xf32>
    %194 = vector.broadcast %193 : vector<8x1xf32> to vector<8x16xf32>
    %195 = arith.subf %191, %194 : vector<8x16xf32>
    %196 = math.exp %195 : vector<8x16xf32>
    %cst_63 = arith.constant dense<0.000000e+00> : vector<8xf32>
    %197 = vector.multi_reduction <add>, %196, %cst_63 [1] : vector<8x16xf32> to vector<8xf32>
    %198 = vector.shape_cast %197 : vector<8xf32> to vector<8x1xf32>
    %199 = tpu.reciprocal %198 {approx = true} : vector<8x1xf32> -> vector<8x1xf32>
    %200 = vector.broadcast %199 : vector<8x1xf32> to vector<8x16xf32>
    %201 = arith.mulf %196, %200 : vector<8x16xf32>
    %202 = vector.extract_strided_slice %187 {offsets = [0, 0], sizes = [16, 32], strides = [1, 1]} : vector<16x128xf32> to vector<16x32xf32>
    %cst_64 = arith.constant dense<0.000000e+00> : vector<8x32xf32>
    %203 = tpu.matmul %201, %202, %cst_64 {dimension_numbers = #tpu.dot_dimension_numbers<[1], [0], [0], [1], [0, 0, 1, 1], [], []>} : vector<8x16xf32>, vector<16x32xf32>, vector<8x32xf32> -> vector<8x32xf32>
    %204 = arith.addf %188, %203 : vector<8x32xf32>
    %205 = vector.extract_strided_slice %176 {offsets = [0, 8], sizes = [8, 8], strides = [1, 1]} : vector<16x32xf32> to vector<8x8xf32>
    %206 = vector.extract_strided_slice %186 {offsets = [8, 0], sizes = [8, 16], strides = [1, 1]} : vector<32x16xf32> to vector<8x16xf32>
    %cst_65 = arith.constant dense<0.000000e+00> : vector<8x16xf32>
    %207 = tpu.matmul %205, %206, %cst_65 {dimension_numbers = #tpu.dot_dimension_numbers<[1], [0], [0], [1], [0, 0, 1, 1], [], []>} : vector<8x8xf32>, vector<8x16xf32>, vector<8x16xf32> -> vector<8x16xf32>
    %cst_66 = arith.constant dense<0xFF800000> : vector<8xf32>
    %208 = vector.multi_reduction <maximumf>, %207, %cst_66 [1] : vector<8x16xf32> to vector<8xf32>
    %209 = vector.shape_cast %208 : vector<8xf32> to vector<8x1xf32>
    %210 = vector.broadcast %209 : vector<8x1xf32> to vector<8x16xf32>
    %211 = arith.subf %207, %210 : vector<8x16xf32>
    %212 = math.exp %211 : vector<8x16xf32>
    %cst_67 = arith.constant dense<0.000000e+00> : vector<8xf32>
    %213 = vector.multi_reduction <add>, %212, %cst_67 [1] : vector<8x16xf32> to vector<8xf32>
    %214 = vector.shape_cast %213 : vector<8xf32> to vector<8x1xf32>
    %215 = tpu.reciprocal %214 {approx = true} : vector<8x1xf32> -> vector<8x1xf32>
    %216 = vector.broadcast %215 : vector<8x1xf32> to vector<8x16xf32>
    %217 = arith.mulf %212, %216 : vector<8x16xf32>
    %218 = vector.extract_strided_slice %187 {offsets = [0, 32], sizes = [16, 32], strides = [1, 1]} : vector<16x128xf32> to vector<16x32xf32>
    %cst_68 = arith.constant dense<0.000000e+00> : vector<8x32xf32>
    %219 = tpu.matmul %217, %218, %cst_68 {dimension_numbers = #tpu.dot_dimension_numbers<[1], [0], [0], [1], [0, 0, 1, 1], [], []>} : vector<8x16xf32>, vector<16x32xf32>, vector<8x32xf32> -> vector<8x32xf32>
    %220 = arith.addf %204, %219 : vector<8x32xf32>
    %221 = vector.extract_strided_slice %176 {offsets = [0, 16], sizes = [8, 8], strides = [1, 1]} : vector<16x32xf32> to vector<8x8xf32>
    %222 = vector.extract_strided_slice %186 {offsets = [16, 0], sizes = [8, 16], strides = [1, 1]} : vector<32x16xf32> to vector<8x16xf32>
    %cst_69 = arith.constant dense<0.000000e+00> : vector<8x16xf32>
    %223 = tpu.matmul %221, %222, %cst_69 {dimension_numbers = #tpu.dot_dimension_numbers<[1], [0], [0], [1], [0, 0, 1, 1], [], []>} : vector<8x8xf32>, vector<8x16xf32>, vector<8x16xf32> -> vector<8x16xf32>
    %cst_70 = arith.constant dense<0xFF800000> : vector<8xf32>
    %224 = vector.multi_reduction <maximumf>, %223, %cst_70 [1] : vector<8x16xf32> to vector<8xf32>
    %225 = vector.shape_cast %224 : vector<8xf32> to vector<8x1xf32>
    %226 = vector.broadcast %225 : vector<8x1xf32> to vector<8x16xf32>
    %227 = arith.subf %223, %226 : vector<8x16xf32>
    %228 = math.exp %227 : vector<8x16xf32>
    %cst_71 = arith.constant dense<0.000000e+00> : vector<8xf32>
    %229 = vector.multi_reduction <add>, %228, %cst_71 [1] : vector<8x16xf32> to vector<8xf32>
    %230 = vector.shape_cast %229 : vector<8xf32> to vector<8x1xf32>
    %231 = tpu.reciprocal %230 {approx = true} : vector<8x1xf32> -> vector<8x1xf32>
    %232 = vector.broadcast %231 : vector<8x1xf32> to vector<8x16xf32>
    %233 = arith.mulf %228, %232 : vector<8x16xf32>
    %234 = vector.extract_strided_slice %187 {offsets = [0, 64], sizes = [16, 32], strides = [1, 1]} : vector<16x128xf32> to vector<16x32xf32>
    %cst_72 = arith.constant dense<0.000000e+00> : vector<8x32xf32>
    %235 = tpu.matmul %233, %234, %cst_72 {dimension_numbers = #tpu.dot_dimension_numbers<[1], [0], [0], [1], [0, 0, 1, 1], [], []>} : vector<8x16xf32>, vector<16x32xf32>, vector<8x32xf32> -> vector<8x32xf32>
    %236 = arith.addf %220, %235 : vector<8x32xf32>
    %237 = vector.extract_strided_slice %176 {offsets = [0, 24], sizes = [8, 8], strides = [1, 1]} : vector<16x32xf32> to vector<8x8xf32>
    %238 = vector.extract_strided_slice %186 {offsets = [24, 0], sizes = [8, 16], strides = [1, 1]} : vector<32x16xf32> to vector<8x16xf32>
    %cst_73 = arith.constant dense<0.000000e+00> : vector<8x16xf32>
    %239 = tpu.matmul %237, %238, %cst_73 {dimension_numbers = #tpu.dot_dimension_numbers<[1], [0], [0], [1], [0, 0, 1, 1], [], []>} : vector<8x8xf32>, vector<8x16xf32>, vector<8x16xf32> -> vector<8x16xf32>
    %cst_74 = arith.constant dense<0xFF800000> : vector<8xf32>
    %240 = vector.multi_reduction <maximumf>, %239, %cst_74 [1] : vector<8x16xf32> to vector<8xf32>
    %241 = vector.shape_cast %240 : vector<8xf32> to vector<8x1xf32>
    %242 = vector.broadcast %241 : vector<8x1xf32> to vector<8x16xf32>
    %243 = arith.subf %239, %242 : vector<8x16xf32>
    %244 = math.exp %243 : vector<8x16xf32>
    %cst_75 = arith.constant dense<0.000000e+00> : vector<8xf32>
    %245 = vector.multi_reduction <add>, %244, %cst_75 [1] : vector<8x16xf32> to vector<8xf32>
    %246 = vector.shape_cast %245 : vector<8xf32> to vector<8x1xf32>
    %247 = tpu.reciprocal %246 {approx = true} : vector<8x1xf32> -> vector<8x1xf32>
    %248 = vector.broadcast %247 : vector<8x1xf32> to vector<8x16xf32>
    %249 = arith.mulf %244, %248 : vector<8x16xf32>
    %250 = vector.extract_strided_slice %187 {offsets = [0, 96], sizes = [16, 32], strides = [1, 1]} : vector<16x128xf32> to vector<16x32xf32>
    %cst_76 = arith.constant dense<0.000000e+00> : vector<8x32xf32>
    %251 = tpu.matmul %249, %250, %cst_76 {dimension_numbers = #tpu.dot_dimension_numbers<[1], [0], [0], [1], [0, 0, 1, 1], [], []>} : vector<8x16xf32>, vector<16x32xf32>, vector<8x32xf32> -> vector<8x32xf32>
    %252 = arith.addf %236, %251 : vector<8x32xf32>
    %253 = vector.extract_strided_slice %181 {offsets = [16, 0], sizes = [16, 32], strides = [1, 1]} : vector<32x32xf32> to vector<16x32xf32>
    %254 = tpu.transpose %253, [1, 0] : vector<16x32xf32> -> vector<32x16xf32>
    %255 = vector.extract_strided_slice %183 {offsets = [16, 0], sizes = [16, 128], strides = [1, 1]} : vector<32x128xf32> to vector<16x128xf32>
    %cst_77 = arith.constant 0.000000e+00 : f32
    %256 = vector.broadcast %cst_77 : f32 to vector<8x32xf32>
    %257 = vector.extract_strided_slice %176 {offsets = [8, 0], sizes = [8, 8], strides = [1, 1]} : vector<16x32xf32> to vector<8x8xf32>
    %258 = vector.extract_strided_slice %254 {offsets = [0, 0], sizes = [8, 16], strides = [1, 1]} : vector<32x16xf32> to vector<8x16xf32>
    %cst_78 = arith.constant dense<0.000000e+00> : vector<8x16xf32>
    %259 = tpu.matmul %257, %258, %cst_78 {dimension_numbers = #tpu.dot_dimension_numbers<[1], [0], [0], [1], [0, 0, 1, 1], [], []>} : vector<8x8xf32>, vector<8x16xf32>, vector<8x16xf32> -> vector<8x16xf32>
    %cst_79 = arith.constant dense<0xFF800000> : vector<8xf32>
    %260 = vector.multi_reduction <maximumf>, %259, %cst_79 [1] : vector<8x16xf32> to vector<8xf32>
    %261 = vector.shape_cast %260 : vector<8xf32> to vector<8x1xf32>
    %262 = vector.broadcast %261 : vector<8x1xf32> to vector<8x16xf32>
    %263 = arith.subf %259, %262 : vector<8x16xf32>
    %264 = math.exp %263 : vector<8x16xf32>
    %cst_80 = arith.constant dense<0.000000e+00> : vector<8xf32>
    %265 = vector.multi_reduction <add>, %264, %cst_80 [1] : vector<8x16xf32> to vector<8xf32>
    %266 = vector.shape_cast %265 : vector<8xf32> to vector<8x1xf32>
    %267 = tpu.reciprocal %266 {approx = true} : vector<8x1xf32> -> vector<8x1xf32>
    %268 = vector.broadcast %267 : vector<8x1xf32> to vector<8x16xf32>
    %269 = arith.mulf %264, %268 : vector<8x16xf32>
    %270 = vector.extract_strided_slice %255 {offsets = [0, 0], sizes = [16, 32], strides = [1, 1]} : vector<16x128xf32> to vector<16x32xf32>
    %cst_81 = arith.constant dense<0.000000e+00> : vector<8x32xf32>
    %271 = tpu.matmul %269, %270, %cst_81 {dimension_numbers = #tpu.dot_dimension_numbers<[1], [0], [0], [1], [0, 0, 1, 1], [], []>} : vector<8x16xf32>, vector<16x32xf32>, vector<8x32xf32> -> vector<8x32xf32>
    %272 = arith.addf %256, %271 : vector<8x32xf32>
    %273 = vector.extract_strided_slice %176 {offsets = [8, 8], sizes = [8, 8], strides = [1, 1]} : vector<16x32xf32> to vector<8x8xf32>
    %274 = vector.extract_strided_slice %254 {offsets = [8, 0], sizes = [8, 16], strides = [1, 1]} : vector<32x16xf32> to vector<8x16xf32>
    %cst_82 = arith.constant dense<0.000000e+00> : vector<8x16xf32>
    %275 = tpu.matmul %273, %274, %cst_82 {dimension_numbers = #tpu.dot_dimension_numbers<[1], [0], [0], [1], [0, 0, 1, 1], [], []>} : vector<8x8xf32>, vector<8x16xf32>, vector<8x16xf32> -> vector<8x16xf32>
    %cst_83 = arith.constant dense<0xFF800000> : vector<8xf32>
    %276 = vector.multi_reduction <maximumf>, %275, %cst_83 [1] : vector<8x16xf32> to vector<8xf32>
    %277 = vector.shape_cast %276 : vector<8xf32> to vector<8x1xf32>
    %278 = vector.broadcast %277 : vector<8x1xf32> to vector<8x16xf32>
    %279 = arith.subf %275, %278 : vector<8x16xf32>
    %280 = math.exp %279 : vector<8x16xf32>
    %cst_84 = arith.constant dense<0.000000e+00> : vector<8xf32>
    %281 = vector.multi_reduction <add>, %280, %cst_84 [1] : vector<8x16xf32> to vector<8xf32>
    %282 = vector.shape_cast %281 : vector<8xf32> to vector<8x1xf32>
    %283 = tpu.reciprocal %282 {approx = true} : vector<8x1xf32> -> vector<8x1xf32>
    %284 = vector.broadcast %283 : vector<8x1xf32> to vector<8x16xf32>
    %285 = arith.mulf %280, %284 : vector<8x16xf32>
    %286 = vector.extract_strided_slice %255 {offsets = [0, 32], sizes = [16, 32], strides = [1, 1]} : vector<16x128xf32> to vector<16x32xf32>
    %cst_85 = arith.constant dense<0.000000e+00> : vector<8x32xf32>
    %287 = tpu.matmul %285, %286, %cst_85 {dimension_numbers = #tpu.dot_dimension_numbers<[1], [0], [0], [1], [0, 0, 1, 1], [], []>} : vector<8x16xf32>, vector<16x32xf32>, vector<8x32xf32> -> vector<8x32xf32>
    %288 = arith.addf %272, %287 : vector<8x32xf32>
    %289 = vector.extract_strided_slice %176 {offsets = [8, 16], sizes = [8, 8], strides = [1, 1]} : vector<16x32xf32> to vector<8x8xf32>
    %290 = vector.extract_strided_slice %254 {offsets = [16, 0], sizes = [8, 16], strides = [1, 1]} : vector<32x16xf32> to vector<8x16xf32>
    %cst_86 = arith.constant dense<0.000000e+00> : vector<8x16xf32>
    %291 = tpu.matmul %289, %290, %cst_86 {dimension_numbers = #tpu.dot_dimension_numbers<[1], [0], [0], [1], [0, 0, 1, 1], [], []>} : vector<8x8xf32>, vector<8x16xf32>, vector<8x16xf32> -> vector<8x16xf32>
    %cst_87 = arith.constant dense<0xFF800000> : vector<8xf32>
    %292 = vector.multi_reduction <maximumf>, %291, %cst_87 [1] : vector<8x16xf32> to vector<8xf32>
    %293 = vector.shape_cast %292 : vector<8xf32> to vector<8x1xf32>
    %294 = vector.broadcast %293 : vector<8x1xf32> to vector<8x16xf32>
    %295 = arith.subf %291, %294 : vector<8x16xf32>
    %296 = math.exp %295 : vector<8x16xf32>
    %cst_88 = arith.constant dense<0.000000e+00> : vector<8xf32>
    %297 = vector.multi_reduction <add>, %296, %cst_88 [1] : vector<8x16xf32> to vector<8xf32>
    %298 = vector.shape_cast %297 : vector<8xf32> to vector<8x1xf32>
    %299 = tpu.reciprocal %298 {approx = true} : vector<8x1xf32> -> vector<8x1xf32>
    %300 = vector.broadcast %299 : vector<8x1xf32> to vector<8x16xf32>
    %301 = arith.mulf %296, %300 : vector<8x16xf32>
    %302 = vector.extract_strided_slice %255 {offsets = [0, 64], sizes = [16, 32], strides = [1, 1]} : vector<16x128xf32> to vector<16x32xf32>
    %cst_89 = arith.constant dense<0.000000e+00> : vector<8x32xf32>
    %303 = tpu.matmul %301, %302, %cst_89 {dimension_numbers = #tpu.dot_dimension_numbers<[1], [0], [0], [1], [0, 0, 1, 1], [], []>} : vector<8x16xf32>, vector<16x32xf32>, vector<8x32xf32> -> vector<8x32xf32>
    %304 = arith.addf %288, %303 : vector<8x32xf32>
    %305 = vector.extract_strided_slice %176 {offsets = [8, 24], sizes = [8, 8], strides = [1, 1]} : vector<16x32xf32> to vector<8x8xf32>
    %306 = vector.extract_strided_slice %254 {offsets = [24, 0], sizes = [8, 16], strides = [1, 1]} : vector<32x16xf32> to vector<8x16xf32>
    %cst_90 = arith.constant dense<0.000000e+00> : vector<8x16xf32>
    %307 = tpu.matmul %305, %306, %cst_90 {dimension_numbers = #tpu.dot_dimension_numbers<[1], [0], [0], [1], [0, 0, 1, 1], [], []>} : vector<8x8xf32>, vector<8x16xf32>, vector<8x16xf32> -> vector<8x16xf32>
    %cst_91 = arith.constant dense<0xFF800000> : vector<8xf32>
    %308 = vector.multi_reduction <maximumf>, %307, %cst_91 [1] : vector<8x16xf32> to vector<8xf32>
    %309 = vector.shape_cast %308 : vector<8xf32> to vector<8x1xf32>
    %310 = vector.broadcast %309 : vector<8x1xf32> to vector<8x16xf32>
    %311 = arith.subf %307, %310 : vector<8x16xf32>
    %312 = math.exp %311 : vector<8x16xf32>
    %cst_92 = arith.constant dense<0.000000e+00> : vector<8xf32>
    %313 = vector.multi_reduction <add>, %312, %cst_92 [1] : vector<8x16xf32> to vector<8xf32>
    %314 = vector.shape_cast %313 : vector<8xf32> to vector<8x1xf32>
    %315 = tpu.reciprocal %314 {approx = true} : vector<8x1xf32> -> vector<8x1xf32>
    %316 = vector.broadcast %315 : vector<8x1xf32> to vector<8x16xf32>
    %317 = arith.mulf %312, %316 : vector<8x16xf32>
    %318 = vector.extract_strided_slice %255 {offsets = [0, 96], sizes = [16, 32], strides = [1, 1]} : vector<16x128xf32> to vector<16x32xf32>
    %cst_93 = arith.constant dense<0.000000e+00> : vector<8x32xf32>
    %319 = tpu.matmul %317, %318, %cst_93 {dimension_numbers = #tpu.dot_dimension_numbers<[1], [0], [0], [1], [0, 0, 1, 1], [], []>} : vector<8x16xf32>, vector<16x32xf32>, vector<8x32xf32> -> vector<8x32xf32>
    %320 = arith.addf %304, %319 : vector<8x32xf32>
    %321 = tpu.concatenate %252, %320 in 0 : vector<8x32xf32>, vector<8x32xf32> -> vector<16x32xf32>
    %322 = vector.broadcast %184 : vector<1x32xf32> to vector<16x32xf32>
    %323 = arith.addf %321, %322 : vector<16x32xf32>
    %324 = arith.addf %171, %323 : vector<16x32xf32>
    %c9 = arith.constant 9 : index
    %c0_94 = arith.constant 0 : index
    %325 = vector.load %arg4[%c9, %c0_94] : memref<16x128xf32, #tpu.memory_space<vmem>>, vector<1x32xf32>
    %c10 = arith.constant 10 : index
    %c0_95 = arith.constant 0 : index
    %326 = vector.load %arg4[%c10, %c0_95] : memref<16x128xf32, #tpu.memory_space<vmem>>, vector<1x32xf32>
    %cst_96 = arith.constant dense<0.000000e+00> : vector<16xf32>
    %327 = vector.multi_reduction <add>, %324, %cst_96 [1] : vector<16x32xf32> to vector<16xf32>
    %328 = vector.shape_cast %327 : vector<16xf32> to vector<16x1xf32>
    %cst_97 = arith.constant 3.200000e+01 : f32
    %329 = vector.broadcast %cst_97 : f32 to vector<16x1xf32>
    %330 = arith.divf %328, %329 : vector<16x1xf32>
    %331 = vector.broadcast %330 : vector<16x1xf32> to vector<16x32xf32>
    %332 = arith.subf %324, %331 : vector<16x32xf32>
    %333 = arith.mulf %332, %332 : vector<16x32xf32>
    %cst_98 = arith.constant dense<0.000000e+00> : vector<16xf32>
    %334 = vector.multi_reduction <add>, %333, %cst_98 [1] : vector<16x32xf32> to vector<16xf32>
    %335 = vector.shape_cast %334 : vector<16xf32> to vector<16x1xf32>
    %cst_99 = arith.constant 3.200000e+01 : f32
    %336 = vector.broadcast %cst_99 : f32 to vector<16x1xf32>
    %337 = arith.divf %335, %336 : vector<16x1xf32>
    %cst_100 = arith.constant 9.99999997E-7 : f32
    %338 = vector.broadcast %cst_100 : f32 to vector<16x1xf32>
    %339 = arith.addf %337, %338 : vector<16x1xf32>
    %340 = math.rsqrt %339 : vector<16x1xf32>
    %341 = vector.broadcast %340 : vector<16x1xf32> to vector<16x32xf32>
    %342 = arith.mulf %332, %341 : vector<16x32xf32>
    %343 = vector.broadcast %325 : vector<1x32xf32> to vector<16x32xf32>
    %344 = arith.mulf %342, %343 : vector<16x32xf32>
    %345 = vector.broadcast %326 : vector<1x32xf32> to vector<16x32xf32>
    %346 = arith.addf %344, %345 : vector<16x32xf32>
    %c0_101 = arith.constant 0 : index
    %c640 = arith.constant 640 : index
    %347 = vector.load %arg2[%c0_101, %c640] : memref<32x768xf32, #tpu.memory_space<vmem>>, vector<32x64xf32>
    %cst_102 = arith.constant dense<0.000000e+00> : vector<16x64xf32>
    %348 = tpu.matmul %346, %347, %cst_102 {dimension_numbers = #tpu.dot_dimension_numbers<[1], [0], [0], [1], [0, 0, 1, 1], [], []>} : vector<16x32xf32>, vector<32x64xf32>, vector<16x64xf32> -> vector<16x64xf32>
    %c5 = arith.constant 5 : index
    %c0_103 = arith.constant 0 : index
    %349 = vector.load %arg4[%c5, %c0_103] : memref<16x128xf32, #tpu.memory_space<vmem>>, vector<1x64xf32>
    %350 = vector.broadcast %349 : vector<1x64xf32> to vector<16x64xf32>
    %351 = arith.addf %348, %350 : vector<16x64xf32>
    %cst_104 = arith.constant 0.000000e+00 : f32
    %352 = vector.broadcast %cst_104 : f32 to vector<16x64xf32>
    %353 = arith.maximumf %351, %352 : vector<16x64xf32>
    %c0_105 = arith.constant 0 : index
    %c0_106 = arith.constant 0 : index
    %354 = vector.load %arg3[%c0_105, %c0_106] : memref<64x32xf32, #tpu.memory_space<vmem>>, vector<64x32xf32>
    %cst_107 = arith.constant dense<0.000000e+00> : vector<16x32xf32>
    %355 = tpu.matmul %353, %354, %cst_107 {dimension_numbers = #tpu.dot_dimension_numbers<[1], [0], [0], [1], [0, 0, 1, 1], [], []>} : vector<16x64xf32>, vector<64x32xf32>, vector<16x32xf32> -> vector<16x32xf32>
    %c6 = arith.constant 6 : index
    %c0_108 = arith.constant 0 : index
    %356 = vector.load %arg4[%c6, %c0_108] : memref<16x128xf32, #tpu.memory_space<vmem>>, vector<1x32xf32>
    %357 = vector.broadcast %356 : vector<1x32xf32> to vector<16x32xf32>
    %358 = arith.addf %355, %357 : vector<16x32xf32>
    %359 = arith.addf %346, %358 : vector<16x32xf32>
    %c11 = arith.constant 11 : index
    %c0_109 = arith.constant 0 : index
    %360 = vector.load %arg4[%c11, %c0_109] : memref<16x128xf32, #tpu.memory_space<vmem>>, vector<1x32xf32>
    %c12 = arith.constant 12 : index
    %c0_110 = arith.constant 0 : index
    %361 = vector.load %arg4[%c12, %c0_110] : memref<16x128xf32, #tpu.memory_space<vmem>>, vector<1x32xf32>
    %cst_111 = arith.constant dense<0.000000e+00> : vector<16xf32>
    %362 = vector.multi_reduction <add>, %359, %cst_111 [1] : vector<16x32xf32> to vector<16xf32>
    %363 = vector.shape_cast %362 : vector<16xf32> to vector<16x1xf32>
    %cst_112 = arith.constant 3.200000e+01 : f32
    %364 = vector.broadcast %cst_112 : f32 to vector<16x1xf32>
    %365 = arith.divf %363, %364 : vector<16x1xf32>
    %366 = vector.broadcast %365 : vector<16x1xf32> to vector<16x32xf32>
    %367 = arith.subf %359, %366 : vector<16x32xf32>
    %368 = arith.mulf %367, %367 : vector<16x32xf32>
    %cst_113 = arith.constant dense<0.000000e+00> : vector<16xf32>
    %369 = vector.multi_reduction <add>, %368, %cst_113 [1] : vector<16x32xf32> to vector<16xf32>
    %370 = vector.shape_cast %369 : vector<16xf32> to vector<16x1xf32>
    %cst_114 = arith.constant 3.200000e+01 : f32
    %371 = vector.broadcast %cst_114 : f32 to vector<16x1xf32>
    %372 = arith.divf %370, %371 : vector<16x1xf32>
    %cst_115 = arith.constant 9.99999997E-7 : f32
    %373 = vector.broadcast %cst_115 : f32 to vector<16x1xf32>
    %374 = arith.addf %372, %373 : vector<16x1xf32>
    %375 = math.rsqrt %374 : vector<16x1xf32>
    %376 = vector.broadcast %375 : vector<16x1xf32> to vector<16x32xf32>
    %377 = arith.mulf %367, %376 : vector<16x32xf32>
    %378 = vector.broadcast %360 : vector<1x32xf32> to vector<16x32xf32>
    %379 = arith.mulf %377, %378 : vector<16x32xf32>
    %380 = vector.broadcast %361 : vector<1x32xf32> to vector<16x32xf32>
    %381 = arith.addf %379, %380 : vector<16x32xf32>
    %c0_116 = arith.constant 0 : index
    %c0_117 = arith.constant 0 : index
    %382 = vector.load %arg5[%c0_116, %c0_117] : memref<16x32xf32, #tpu.memory_space<vmem>>, vector<16x32xf32>
    tpu.vector_store %arg5[%c0_116, %c0_117], %381 {strides = array<i32>} : memref<16x32xf32, #tpu.memory_space<vmem>>, vector<16x32xf32>,
    return
  }
}

</mosaic_0001>

<bundles_post_ra>
// kernel: forward.1
= control target key start
LH: loop header
LB: loop body
LE: loop exit
PB: predicated region body
PF: predicated region fallthrough
CT: control target
= control target key end

     0   :  { %10 = vsyncpa [#allocation3], 0  ;;  %s2433_s0 = inlined_call_operand.hbm [shape: f32[16,32], index: 0, kind: input, shape index: {}]   ;;  %s2434_s1 = inlined_call_operand.hbm [shape: f32[32,32], index: 1, kind: input, shape index: {}]   ;;  %s2435_s2 = inlined_call_operand.hbm [shape: f32[32,768], index: 2, kind: input, shape index: {}]   ;;  %s2436_s3 = inlined_call_operand.hbm [shape: f32[64,32], index: 3, kind: input, shape index: {}]   ;;  %s2437_s4 = inlined_call_operand.hbm [shape: f32[16,128], index: 4, kind: input, shape index: {}]   ;;  %s2438_s5 = inlined_call_operand.hbm [shape: f32[16,32], index: 5, kind: output, shape index: {}]  }
   0x1   :  { %11 = vsyncpa [#allocation6], 0 }
   0x2   :  { %12 = vsyncpa [#allocation9], 0 }
   0x3   :  { %13 = vsyncpa [#allocation4], 0  ;;  %s31_s20 = sshll.u32 %s2434_s1, 4  ;;  %s2017_s21 = smov [#allocation5]   ;;  %s32_s20 = int_to_ptr.hbm [resolvable:$true] %s31_s20 }
   0x4   :  { %s33_s22 = sshll.u32 %s2017_s21, 4  ;;  %s57_s25 = sshll.u32 %s2436_s3, 4  ;;  %s34_s22 = int_to_ptr.vmem [resolvable:$true] %s33_s22  ;;  %s58_s25 = int_to_ptr.hbm [resolvable:$true] %s57_s25 }
   0x5   :  { %s2018_s26 = smov 128   ;;  %s2019_s27 = smov 8  }
   0x6   :  { %39 = dma.hbm_to_vmem [thread:$0]  %s32_s20, 512, %s34_s22, [#allocation6], %s2018_s26, %s2018_s26, %s2019_s27  }
   0x7   :  { %s2020_s28 = smov [#allocation8]   ;;  %s18_s1 = sshll.u32 %s2433_s0, 4  ;;  %s19_s1 = int_to_ptr.hbm [resolvable:$true] %s18_s1 }
   0x8   :  { %s59_s29 = sshll.u32 %s2020_s28, 4  ;;  %s44_s8 = sshll.u32 %s2435_s2, 4  ;;  %s60_s29 = int_to_ptr.vmem [resolvable:$true] %s59_s29  ;;  %s45_s8 = int_to_ptr.hbm [resolvable:$true] %s44_s8 }
   0x9   :  { %65 = dma.hbm_to_vmem [thread:$0]  %s58_s25, 1024, %s60_s29, [#allocation9], %s2018_s26, %s2018_s26, %s2019_s27  }
   0xa   :  { %s2021_s9 = smov [#allocation2]   ;;  %s2022_s11 = smov [#allocation7]  }
   0xb   :  { %s20_s10 = sshll.u32 %s2021_s9, 4  ;;  %s46_s0 = sshll.u32 %s2022_s11, 4  ;;  %s21_s10 = int_to_ptr.vmem [resolvable:$true] %s20_s10  ;;  %s47_s0 = int_to_ptr.vmem [resolvable:$true] %s46_s0 }
   0xc   :  { %26 = dma.hbm_to_vmem [thread:$0]  %s19_s1, 256, %s21_s10, [#allocation3], %s2018_s26, %s2018_s26, %s2019_s27  }
   0xd   :  { %s2023_s12 = smov 768   ;;  %s2024_s13 = smov 48  }
   0xe   :  { %52 = dma.hbm_to_vmem [thread:$0]  %s45_s8, 3072, %s47_s0, [#allocation6], %s2023_s12, %s2023_s12, %s2024_s13  }
   0xf   :  { %s70_s16 = sshll.u32 %s2437_s4, 4  ;;  %s2025_s2 = smov [#allocation10]   ;;  %s71_s16 = int_to_ptr.hbm [resolvable:$true] %s70_s16 }
  0x10   :  { %s72_s17 = sshll.u32 %s2025_s2, 4  ;;  %s73_s17 = int_to_ptr.vmem [resolvable:$true] %s72_s17 }
  0x11   :  { %78 = dma.hbm_to_vmem [thread:$0]  %s71_s16, 256, %s73_s17, [#allocation9], %s2018_s26, %s2018_s26, %s2019_s27  }
  0x12   :  { %2009 = dma.done.wait [#allocation3], 256  }
  0x13   :  { %2010 = vsyncadd [#allocation3], 4294967040 }
  0x14   :  { %2011 = dma.done.wait [#allocation6], 3584  }
  0x15   :  { %2012 = vsyncadd [#allocation6], 4294963712 }
  0x16   :  { %2013 = dma.done.wait [#allocation9], 1280  }
  0x17   :  { %2014 = vsyncadd [#allocation9], 4294966016  ;;  %v108_v0 = vld [vmem:[#allocation7 + $0x90] sm:$0xff]  ;;  %v107_v1 = vld [vmem:[#allocation7 + $0x60] sm:$0xff]  ;;  %vm111_vm0 = vcmask 261120   ;;  %s2026_s4 = smov 88  }
  0x18   :  { %130 = vmatpush.msra.mxu0 %v108_v0  ;;  %v106_v2 = vld [vmem:[#allocation7 + $0x30] sm:$0xff]  ;;  %v105_v3 = vld [vmem:[#allocation7] sm:$0xff]  ;;  %s2027_s18 = smov 120   ;;  %s2028_s19 = smov 80   ;;  %vm172_vm1 = vcmask 64512   ;;  %v144_v10 = vld [vmem:[#allocation7 + $0x98] sm:$0xff] }
  0x19   :  { %v2094_v4 = vld [vmem:[#allocation2] sm:$0xff]  ;;  %v2098_v5 = vld [vmem:[#allocation10] ss:$0 sm:$0xff]  ;;  %s2029_s20 = smov 112   ;;  %v143_v11 = vld [vmem:[#allocation7 + $0x68] sm:$0xff]  ;;  %157 = vmatpush.msra.mxu1 %v144_v10  ;;  %1720 = vmatpush.msra.mxu2 %v144_v10  ;;  %s2030_s21 = smov 96  }
  0x1a   :  { %131 = vmatpush.msra.mxu0 %v107_v1  ;;  %v142_v12 = vld [vmem:[#allocation7 + $0x38] sm:$0xff]  ;;  %v141_v13 = vld [vmem:[#allocation7 + $0x8] sm:$0xff]  ;;  %s2031_s22 = smov 64   ;;  %s2032_s23 = smov 72   ;;  %vm897_vm6 = vcmask 130048  }
  0x1b   :  { %158 = vmatpush.msra.mxu1 %v143_v11  ;;  %1721 = vmatpush.msra.mxu2 %v143_v11  ;;  %v2118_v16 = vld [vmem:[#allocation2 + $0x8] sm:$0xff]  ;;  %s2033_s24 = smov 32   ;;  %s2034_s25 = smov 104  }
  0x1c   :  { %132 = vmatpush.msra.mxu0 %v106_v2  ;;  %s2036_s28 = smov [#allocation11]   ;;  %s1631_s1 = sshll.u32 %s2438_s5, 4  ;;  %s1632_s1 = int_to_ptr.hbm [resolvable:$true] %s1631_s1 }
  0x1d   :  { %159 = vmatpush.msra.mxu1 %v142_v12  ;;  %1722 = vmatpush.msra.mxu2 %v142_v12  ;;  %s1629_s29 = sshll.u32 %s2036_s28, 4  ;;  %s1630_s29 = int_to_ptr.vmem [resolvable:$true] %s1629_s29 }
  0x1e   :  { %133 = vmatpush.msra.mxu0 %v105_v3 }
  0x1f   :  { %1646 = vmatmul.msk.f32.vlgmr.msra.gmra.mxu0 %vm111_vm0, %v2094_v4  ;;  %160 = vmatpush.msra.mxu1 %v141_v13 }
  0x20   :  { %1648 = vmatmul.msk.f32.vlgmr.msra.gmra.mxu1 %vm111_vm0, %v2094_v4  ;;  %1723 = vmatpush.msra.mxu2 %v141_v13 }
  0x21   :  { %1649 = vmatmul.msk.f32.vlgmr.msra.gmra.mxu2 %vm111_vm0, %v2118_v16 }
  0x27   :  { %1647 = vmatmul.msk.f32.gmra.mxu0 %vm111_vm0, %v2118_v16 }
  0x9c   :  { %v135_v6 = vpop.f32.mrf.mxu0 }
  0x9d   :  { %v2101_v7 = vadd.f32 %v2098_v5, %v135_v6  ;;  %v162_v21 = vpop.f32.mrf.mxu1 }
  0x9f   :  { %210 = vrot.lane.b32.xlu0 %v2101_v7, %s2026_s4 }
  0xa4   :  { %v2132_v30 = vpop.f32.mrf.mxu2  ;;  %v138_v39 = vpop.f32.mrf.mxu0 }
  0xa5   :  { %v2140_v40 = vadd.f32 %v2098_v5, %v138_v39 }
  0xa7   :  { %208 = vrot.lane.b32.xlu0 %v2101_v7, %s2027_s18 }
  0xaf   :  { %299 = vrot.lane.b32.xlu0 %v2101_v7, %s2028_s19 }
  0xb7   :  { %297 = vrot.lane.b32.xlu0 %v2101_v7, %s2029_s20 }
 0x111   :  { %v211_v8 = vpop.permute.xlu0 %210 }
 0x112   :  { %1652 = vmatpush.xpose.msk.msra.mxu3 %vm172_vm1, %v211_v8 }
 0x116   :  { %292 = vmatpush.msrb.mxu3 %v162_v21 }
 0x119   :  { %v209_v9 = vpop.permute.xlu0 %208 }
 0x11a   :  { %1653 = vmatmul.msk.f32.vlgmr.msra.gmra.mxu3 %vm172_vm1, %v209_v9 }
 0x121   :  { %v300_v26 = vpop.permute.xlu0 %299 }
 0x129   :  { %v298_v29 = vpop.permute.xlu0 %297 }
 0x19d   :  { %v233_v14 = vpop.f32.mrf.mxu3 }
 0x19e   :  { %v236_v15 = vsel %vm172_vm1, %v233_v14, -inf }
 0x19f   :  { %237 = vmax.xlane.f32.xlu1 %v236_v15 }
 0x1b8   :  { %170 = vrot.lane.b32.xlu1 %v2101_v7, %s2030_s21 }
 0x212   :  { %v238_v17 = vpop.xlane.xlu1 %237 }
 0x213   :  { %v239_v18 = vsub.f32 %v233_v14, %v238_v17 }
 0x215   :  { %v240_v19 = vmul.f32 1.442695, %v239_v18 }
 0x217   :  { %1787 = vpow2.f32 %v240_v19 }
 0x21d   :  { %v1788_v20 = vpop.eup %1787 }
 0x21e   :  { %v242_v22 = vsel %vm172_vm1, %v1788_v20, 0.0 }
 0x21f   :  { %243 = vadd.xlane.f32.xlu2 %v242_v22 }
 0x22a   :  { %v171_v23 = vpop.permute.xlu1 %170 }
 0x22b   :  { %1650 = vmatpush.xpose.msk.msrb.mxu2 %vm172_vm1, %v171_v23 }
 0x22e   :  { %1651 = vmatmul.msk.f32.vlgmr.msrb.gmra.mxu2 %vm172_vm1, %v2101_v7 }
 0x237   :  { %248 = vrot.lane.b32.xlu2 %v162_v21, %s2030_s21 }
 0x292   :  { %v244_v24 = vpop.xlane.xlu2 %243 }
 0x293   :  { %1789 = vrcp.f32 %v244_v24 }
 0x299   :  { %v1790_v25 = vpop.eup %1789 }
 0x29a   :  { %v246_v27 = vmul.f32 %v1790_v25, %v1788_v20  ;;  %v249_v28 = vpop.permute.xlu2 %248 }
 0x29b   :  { %269 = vmatpush.msra.mxu2 %v249_v28 }
 0x29c   :  { %1654 = vmatmul.msk.f32.vlgmr.msra.gmra.mxu2 %vm172_vm1, %v246_v27 }
 0x29d   :  { %1656 = vmatpush.xpose.msk.msrb.mxu2 %vm172_vm1, %v300_v26 }
 0x2a4   :  { %1657 = vmatmul.msk.f32.vlgmr.msrb.gmra.mxu2 %vm172_vm1, %v298_v29 }
 0x2b1   :  { %v194_v31 = vpop.f32.mrf.mxu2 }
 0x2b2   :  { %v197_v32 = vsel %vm172_vm1, %v194_v31, -inf }
 0x2b3   :  { %198 = vmax.xlane.f32.xlu0 %v197_v32 }
 0x2c7   :  { %336 = vrot.lane.b32.xlu0 %v162_v21, %s2031_s22 }
 0x2cf   :  { %469 = vrot.lane.b32.xlu0 %v2140_v40, %s2026_s4 }
 0x31f   :  { %v2136_v33 = vpop.f32.mrf.mxu2 }
 0x326   :  { %v199_v34 = vpop.xlane.xlu0 %198 }
 0x327   :  { %v200_v35 = vsub.f32 %v194_v31, %v199_v34  ;;  %v322_v36 = vpop.f32.mrf.mxu2 }
 0x328   :  { %v325_v37 = vsel %vm172_vm1, %v322_v36, -inf }
 0x329   :  { %v201_v38 = vmul.f32 1.442695, %v200_v35  ;;  %326 = vmax.xlane.f32.xlu2 %v325_v37 }
 0x32b   :  { %1791 = vpow2.f32 %v201_v38  ;;  %v2190_v38 = vld [vmem:[#allocation10 + $0x1] ss:$0 sm:$0xff] }
 0x331   :  { %v1792_v41 = vpop.eup %1791 }
 0x332   :  { %v203_v42 = vsel %vm172_vm1, %v1792_v41, 0.0 }
 0x333   :  { %204 = vadd.xlane.f32.xlu1 %v203_v42 }
 0x339   :  { %v337_v43 = vpop.permute.xlu0 %336 }
 0x33a   :  { %357 = vmatpush.msra.mxu3 %v337_v43 }
 0x341   :  { %v470_v61 = vpop.permute.xlu0 %469 }
 0x34c   :  { %365 = vrot.lane.b32.xlu1 %v2101_v7, %s2032_s23 }
 0x354   :  { %467 = vrot.lane.b32.xlu1 %v2140_v40, %s2027_s18 }
 0x35c   :  { %558 = vrot.lane.b32.xlu1 %v2140_v40, %s2028_s19 }
 0x364   :  { %556 = vrot.lane.b32.xlu1 %v2140_v40, %s2029_s20 }
 0x36c   :  { %402 = vrot.lane.b32.xlu1 %v162_v21, %s2033_s24 }
 0x39c   :  { %v327_v44 = vpop.xlane.xlu2 %326 }
 0x39d   :  { %v328_v45 = vsub.f32 %v322_v36, %v327_v44  ;;  %v2035_v44 = vmov 32.0  }
 0x39f   :  { %v329_v46 = vmul.f32 1.442695, %v328_v45 }
 0x3a1   :  { %1793 = vpow2.f32 %v329_v46 }
 0x3a6   :  { %v205_v47 = vpop.xlane.xlu1 %204 }
 0x3a7   :  { %v1794_v48 = vpop.eup %1793  ;;  %1795 = vrcp.f32 %v205_v47 }
 0x3a8   :  { %v331_v49 = vsel %vm172_vm1, %v1794_v48, 0.0 }
 0x3a9   :  { %332 = vadd.xlane.f32.xlu2 %v331_v49 }
 0x3ad   :  { %v1796_v50 = vpop.eup %1795 }
 0x3ae   :  { %v207_v51 = vmul.f32 %v1796_v50, %v1792_v41 }
 0x3b0   :  { %1655 = vmatmul.msk.f32.vlgmr.msrb.gmra.mxu3 %vm172_vm1, %v207_v51 }
 0x3be   :  { %v366_v52 = vpop.permute.xlu1 %365 }
 0x3bf   :  { %1659 = vmatpush.xpose.msk.msrb.mxu3 %vm172_vm1, %v366_v52 }
 0x3c1   :  { %363 = vrot.lane.b32.xlu2 %v2101_v7, %s2034_s25 }
 0x3c6   :  { %v468_v53 = vpop.permute.xlu1 %467 }
 0x3c9   :  { %430 = vrot.lane.b32.xlu2 %v2140_v40, %s2030_s21 }
 0x3ce   :  { %v559_v54 = vpop.permute.xlu1 %558 }
 0x3d6   :  { %v557_v55 = vpop.permute.xlu1 %556 }
 0x3de   :  { %v403_v56 = vpop.permute.xlu1 %402 }
 0x3df   :  { %423 = vmatpush.msrb.mxu1 %v403_v56 }
 0x3e1   :  { %551 = vmatpush.msra.mxu1 %v2132_v30 }
 0x41c   :  { %v333_v57 = vpop.xlane.xlu2 %332 }
 0x41d   :  { %1797 = vrcp.f32 %v333_v57  ;;  %v790_v57 = vld [vmem:[#allocation7 + $0xa8] sm:$0xff] }
 0x423   :  { %v1798_v58 = vpop.eup %1797 }
 0x424   :  { %v335_v59 = vmul.f32 %v1798_v58, %v1794_v48  ;;  %v364_v60 = vpop.permute.xlu2 %363 }
 0x426   :  { %1658 = vmatmul.msk.f32.vlgmr.msra.gmra.mxu3 %vm172_vm1, %v335_v59  ;;  %v789_v59 = vld [vmem:[#allocation7 + $0x78] sm:$0xff] }
 0x427   :  { %1664 = vmatpush.xpose.msk.msra.mxu3 %vm172_vm1, %v470_v61  ;;  %v787_v61 = vld [vmem:[#allocation7 + $0x18] sm:$0xff] }
 0x42c   :  { %v431_v62 = vpop.permute.xlu2 %430 }
 0x42d   :  { %1662 = vmatpush.xpose.msk.msra.mxu2 %vm172_vm1, %v431_v62 }
 0x42e   :  { %1660 = vmatmul.msk.f32.vlgmr.msrb.gmra.mxu3 %vm172_vm1, %v364_v60  ;;  %v788_v60 = vld [vmem:[#allocation7 + $0x48] sm:$0xff] }
 0x430   :  { %1663 = vmatmul.msk.f32.vlgmr.msra.gmra.mxu2 %vm172_vm1, %v2140_v40 }
 0x431   :  { %1668 = vmatpush.xpose.msk.msrb.mxu2 %vm172_vm1, %v559_v54 }
 0x433   :  { %v294_v63 = vpop.f32.mrf.mxu3 }
 0x434   :  { %v295_v36 = vadd.f32 %v294_v63, %v2136_v33  ;;  %v2212_v63 = vld [vmem:[#allocation5] sm:$0xff] }
 0x436   :  { %1665 = vmatmul.msk.f32.vlgmr.msra.gmra.mxu3 %vm172_vm1, %v468_v53 }
 0x438   :  { %1669 = vmatmul.msk.f32.vlgmr.msrb.gmra.mxu2 %vm172_vm1, %v557_v55 }
 0x4a9   :  { %v359_v0 = vpop.f32.mrf.mxu3 }
 0x4aa   :  { %v362_v37 = vadd.f32 %v359_v0, %v295_v36 }
 0x4b1   :  { %v388_v1 = vpop.f32.mrf.mxu3 }
 0x4b2   :  { %v391_v2 = vsel %vm172_vm1, %v388_v1, -inf }
 0x4b3   :  { %392 = vmax.xlane.f32.xlu0 %v391_v2  ;;  %v2181_v17 = vpop.f32.mrf.mxu2 }
 0x4b4   :  { %v456_v62 = vsel %vm172_vm1, %v2181_v17, -inf }
 0x4b9   :  { %v492_v3 = vpop.f32.mrf.mxu3 }
 0x4ba   :  { %v495_v5 = vsel %vm172_vm1, %v492_v3, -inf }
 0x4bb   :  { %496 = vmax.xlane.f32.xlu1 %v495_v5  ;;  %v581_v18 = vpop.f32.mrf.mxu2  ;;  %v755_v5 = vld [vmem:[#allocation7 + $0xa0] sm:$0xff] }
 0x4bc   :  { %v584_v19 = vsel %vm172_vm1, %v581_v18, -inf  ;;  %776 = vmatpush.msra.mxu2 %v755_v5 }
 0x4d4   :  { %622 = vrot.lane.b32.xlu1 %v2140_v40, %s2034_s25 }
 0x526   :  { %v393_v6 = vpop.xlane.xlu0 %392 }
 0x527   :  { %v394_v7 = vsub.f32 %v388_v1, %v393_v6  ;;  %v754_v6 = vld [vmem:[#allocation7 + $0x70] sm:$0xff] }
 0x528   :  { %777 = vmatpush.msra.mxu2 %v754_v6 }
 0x529   :  { %v395_v8 = vmul.f32 1.442695, %v394_v7  ;;  %v753_v7 = vld [vmem:[#allocation7 + $0x40] sm:$0xff] }
 0x52a   :  { %778 = vmatpush.msra.mxu2 %v753_v7 }
 0x52b   :  { %1799 = vpow2.f32 %v395_v8  ;;  %v752_v8 = vld [vmem:[#allocation7 + $0x10] sm:$0xff] }
 0x52c   :  { %779 = vmatpush.msra.mxu2 %v752_v8 }
 0x52e   :  { %v497_v9 = vpop.xlane.xlu1 %496 }
 0x52f   :  { %v498_v10 = vsub.f32 %v492_v3, %v497_v9  ;;  %v2217_v3 = vld [vmem:[#allocation5 + $0x8] sm:$0xff] }
 0x531   :  { %v1800_v11 = vpop.eup %1799  ;;  %v499_v12 = vmul.f32 1.442695, %v498_v10 }
 0x532   :  { %v397_v13 = vsel %vm172_vm1, %v1800_v11, 0.0 }
 0x533   :  { %1801 = vpow2.f32 %v499_v12  ;;  %398 = vadd.xlane.f32.xlu2 %v397_v13 }
 0x539   :  { %v1802_v14 = vpop.eup %1801 }
 0x53a   :  { %v501_v15 = vsel %vm172_vm1, %v1802_v14, 0.0 }
 0x53b   :  { %502 = vadd.xlane.f32.xlu0 %v501_v15 }
 0x546   :  { %v623_v28 = vpop.permute.xlu1 %622 }
 0x54b   :  { %624 = vrot.lane.b32.xlu2 %v2140_v40, %s2032_s23 }
 0x54f   :  { %507 = vrot.lane.b32.xlu0 %v2132_v30, %s2030_s21 }
 0x579   :  { %585 = vmax.xlane.f32.xlu0 %v584_v19 }
 0x5a6   :  { %v399_v20 = vpop.xlane.xlu2 %398 }
 0x5a7   :  { %1803 = vrcp.f32 %v399_v20 }
 0x5ad   :  { %v1804_v21 = vpop.eup %1803 }
 0x5ae   :  { %v401_v22 = vmul.f32 %v1804_v21, %v1800_v11  ;;  %v503_v23 = vpop.xlane.xlu0 %502  ;;  %v625_v27 = vpop.permute.xlu2 %624 }
 0x5af   :  { %1805 = vrcp.f32 %v503_v23 }
 0x5b0   :  { %1661 = vmatmul.msk.f32.vlgmr.msrb.gmra.mxu1 %vm172_vm1, %v401_v22 }
 0x5b5   :  { %v1806_v24 = vpop.eup %1805 }
 0x5b6   :  { %v505_v26 = vmul.f32 %v1806_v24, %v1802_v14 }
 0x5c1   :  { %v508_v25 = vpop.permute.xlu0 %507 }
 0x5c2   :  { %528 = vmatpush.msrb.mxu0 %v508_v25 }
 0x5c3   :  { %1666 = vmatmul.msk.f32.vlgmr.msrb.gmra.mxu0 %vm172_vm1, %v505_v26 }
 0x5c4   :  { %1671 = vmatpush.xpose.msk.msra.mxu0 %vm172_vm1, %v625_v27 }
 0x5cb   :  { %1672 = vmatmul.msk.f32.vlgmr.msra.gmra.mxu0 %vm172_vm1, %v623_v28 }
 0x5ec   :  { %v586_v29 = vpop.xlane.xlu0 %585 }
 0x5ed   :  { %v587_v31 = vsub.f32 %v581_v18, %v586_v29  ;;  %v2224_v29 = vld [vmem:[#allocation10 + $0x7] ss:$0 sm:$0xff] }
 0x5ef   :  { %v588_v32 = vmul.f32 1.442695, %v587_v31 }
 0x5f1   :  { %1807 = vpow2.f32 %v588_v32  ;;  %v2227_v32 = vld [vmem:[#allocation10 + $0x8] ss:$0 sm:$0xff] }
 0x5f2   :  { %1809 = vrcp.f32 %v2035_v44 }
 0x5f7   :  { %v1808_v34 = vpop.eup %1807 }
 0x5f8   :  { %v590_v35 = vsel %vm172_vm1, %v1808_v34, 0.0  ;;  %v1810_v33 = vpop.eup %1809 }
 0x5f9   :  { %591 = vadd.xlane.f32.xlu1 %v590_v35  ;;  %v702_v45 = vmul.f32 32.0, %v1810_v33  ;;  %vm706_vm2 = vweird.f32 %v1810_v33 }
 0x5fb   :  { %v703_v46 = vsub.f32 1.0, %v702_v45 }
 0x5fd   :  { %v704_v47 = vmul.f32 %v1810_v33, %v703_v46 }
 0x5ff   :  { %v705_v48 = vadd.f32 %v1810_v33, %v704_v47 }
 0x601   :  { %v2199_v50 = vsel %vm706_vm2, %v1810_v33, %v705_v48 }
 0x62d   :  { %v425_v39 = vpop.f32.mrf.mxu1 }
 0x62e   :  { %v428_v40 = vadd.f32 %v425_v39, %v362_v37 }
 0x630   :  { %v689_v41 = vadd.f32 %v2190_v38, %v428_v40  ;;  %v2236_v40 = vld [vmem:[#allocation10 + $0x3] ss:$0 sm:$0xff] }
 0x632   :  { %v691_v42 = vadd.f32 %v689_v41, %v2094_v4 }
 0x634   :  { %v695_v43 = vsel %vm111_vm0, %v691_v42, 0.0 }
 0x635   :  { %696 = vadd.xlane.f32.xlu2 %v695_v43 }
 0x640   :  { %v2207_v58 = vpop.f32.mrf.mxu0 }
 0x648   :  { %v647_v1 = vpop.f32.mrf.mxu0 }
 0x649   :  { %v650_v2 = vsel %vm172_vm1, %v647_v1, -inf }
 0x64d   :  { %595 = vrot.lane.b32.xlu2 %v2132_v30, %s2031_s22 }
 0x655   :  { %661 = vrot.lane.b32.xlu2 %v2132_v30, %s2033_s24 }
 0x66c   :  { %v592_v49 = vpop.xlane.xlu1 %591 }
 0x66d   :  { %1811 = vrcp.f32 %v592_v49 }
 0x673   :  { %v1812_v53 = vpop.eup %1811 }
 0x674   :  { %v594_v55 = vmul.f32 %v1812_v53, %v1808_v34 }
 0x6a8   :  { %v697_v4 = vpop.xlane.xlu2 %696 }
 0x6a9   :  { %v708_v51 = vmul.f32 %v2199_v50, %v697_v4  ;;  %v2255_v4 = vld [vmem:[#allocation10 + $0x2] ss:$0 sm:$0xff] }
 0x6ab   :  { %v2202_v52 = vsub.f32 %v691_v42, %v708_v51 }
 0x6ad   :  { %v712_v30 = vmul.f32 %v2202_v52, %v2202_v52 }
 0x6af   :  { %v714_v54 = vsel %vm111_vm0, %v712_v30, 0.0  ;;  %v837_v30 = vld [vmem:[#allocation7 + $0xb0] sm:$0xff] }
 0x6b0   :  { %715 = vadd.xlane.f32.xlu0 %v714_v54  ;;  %v596_v56 = vpop.permute.xlu2 %595  ;;  %v836_v54 = vld [vmem:[#allocation7 + $0x80] sm:$0xff]  ;;  %850 = vmatpush.msrb.mxu0 %v837_v30 }
 0x6b1   :  { %616 = vmatpush.msrb.mxu3 %v596_v56  ;;  %v834_v56 = vld [vmem:[#allocation7 + $0x20] sm:$0xff] }
 0x6b2   :  { %1670 = vmatmul.msk.f32.vlgmr.msrb.gmra.mxu3 %vm172_vm1, %v594_v55  ;;  %v835_v55 = vld [vmem:[#allocation7 + $0x50] sm:$0xff]  ;;  %851 = vmatpush.msrb.mxu0 %v836_v54 }
 0x6b3   :  { %817 = vmatpush.msra.mxu3 %v790_v57 }
 0x6b4   :  { %852 = vmatpush.msrb.mxu0 %v835_v55 }
 0x6b5   :  { %818 = vmatpush.msra.mxu3 %v789_v59 }
 0x6b6   :  { %853 = vmatpush.msrb.mxu0 %v834_v56 }
 0x6b7   :  { %819 = vmatpush.msra.mxu3 %v788_v60  ;;  %1680 = vmatmul.msk.f32.vlgmr.msrb.gmra.mxu0 %vm111_vm0, %v2212_v63 }
 0x6b8   :  { %457 = vmax.xlane.f32.xlu0 %v456_v62  ;;  %v662_v0 = vpop.permute.xlu2 %661 }
 0x6b9   :  { %682 = vmatpush.msrb.mxu1 %v662_v0  ;;  %820 = vmatpush.msra.mxu3 %v787_v61 }
 0x6ba   :  { %1676 = vmatmul.msk.f32.vlgmr.msra.gmra.mxu3 %vm111_vm0, %v2212_v63 }
 0x6bf   :  { %1681 = vmatmul.msk.f32.gmra.mxu0 %vm111_vm0, %v2217_v3 }
 0x6c0   :  { %651 = vmax.xlane.f32.xlu0 %v650_v2 }
 0x6c2   :  { %1677 = vmatmul.msk.f32.gmra.mxu3 %vm111_vm0, %v2217_v3 }
 0x723   :  { %v716_v9 = vpop.xlane.xlu0 %715 }
 0x724   :  { %v720_v10 = vmul.f32 %v716_v9, %v2199_v50 }
 0x726   :  { %v722_v11 = vadd.f32 1e-06, %v720_v10 }
 0x728   :  { %1813 = vrsqrt.f32 %v722_v11  ;;  %vm730_vm4 = vweird.f32 %v722_v11 }
 0x72b   :  { %v458_v12 = vpop.xlane.xlu0 %457 }
 0x72c   :  { %v459_v13 = vsub.f32 %v2181_v17, %v458_v12 }
 0x72e   :  { %v1814_v14 = vpop.eup %1813  ;;  %v460_v15 = vmul.f32 1.442695, %v459_v13 }
 0x72f   :  { %v725_v18 = vmul.f32 %v1814_v14, %v722_v11  ;;  %vm731_vm3 = vweird.f32 %v1814_v14 }
 0x730   :  { %1815 = vpow2.f32 %v460_v15  ;;  %vm732_vm5 = vmor %vm730_vm4, %vm731_vm3 }
 0x731   :  { %v726_v19 = vmul.f32 %v1814_v14, %v725_v18  ;;  %v103_v18 = vld [vmem:[#allocation5 + $0x10] sm:$0xff] }
 0x732   :  { %1678 = vmatmul.msk.f32.gmra.mxu3 %vm111_vm0, %v103_v18  ;;  %1682 = vmatmul.msk.f32.gmra.mxu0 %vm111_vm0, %v103_v18 }
 0x733   :  { %v727_v20 = vmul.f32 0.5, %v726_v19  ;;  %v652_v21 = vpop.xlane.xlu0 %651 }
 0x734   :  { %v653_v22 = vsub.f32 %v647_v1, %v652_v21  ;;  %v855_v63 = vpop.f32.mrf.mxu0  ;;  %v104_v21 = vld [vmem:[#allocation5 + $0x18] sm:$0xff] }
 0x735   :  { %v728_v23 = vsub.f32 1.5, %v727_v20  ;;  %v618_v24 = vpop.f32.mrf.mxu3 }
 0x736   :  { %v1816_v25 = vpop.eup %1815  ;;  %v654_v26 = vmul.f32 1.442695, %v653_v22 }
 0x737   :  { %v729_v27 = vmul.f32 %v1814_v14, %v728_v23  ;;  %v462_v28 = vsel %vm172_vm1, %v1816_v25, 0.0 }
 0x738   :  { %1817 = vpow2.f32 %v654_v26  ;;  %463 = vadd.xlane.f32.xlu0 %v462_v28 }
 0x739   :  { %v733_v17 = vsel %vm732_vm5, %v1814_v14, %v729_v27 }
 0x73a   :  { %v744_v31 = vmul.f32 %v733_v17, %v2202_v52  ;;  %1679 = vmatmul.msk.f32.gmra.mxu3 %vm111_vm0, %v104_v21  ;;  %1683 = vmatmul.msk.f32.gmra.mxu0 %vm111_vm0, %v104_v21 }
 0x73c   :  { %v747_v34 = vmul.f32 %v2224_v29, %v744_v31  ;;  %v858_v6 = vpop.f32.mrf.mxu0 }
 0x73d   :  { %v822_v35 = vpop.f32.mrf.mxu3  ;;  %v2277_v8 = vpack.i.bf16 %v855_v63, %v858_v6 }
 0x73e   :  { %v1818_v36 = vpop.eup %1817  ;;  %v2231_v37 = vadd.f32 %v2227_v32, %v747_v34  ;;  %v2244_v43 = vadd.f32 %v2236_v40, %v822_v35 }
 0x73f   :  { %v656_v39 = vsel %vm172_vm1, %v1818_v36, 0.0 }
 0x740   :  { %1674 = vmatmul.msk.f32.vlgmr.msra.gmra.mxu2 %vm111_vm0, %v2231_v37  ;;  %657 = vadd.xlane.f32.xlu1 %v656_v39 }
 0x745   :  { %v825_v41 = vpop.f32.mrf.mxu3 }
 0x746   :  { %v2239_v42 = vadd.f32 %v2236_v40, %v825_v41 }
 0x74c   :  { %913 = vrot.lane.b32.xlu0 %v2239_v42, %s2027_s18 }
 0x759   :  { %911 = vrot.lane.b32.xlu1 %v2244_v43, %s2027_s18 }
 0x7ab   :  { %v464_v44 = vpop.xlane.xlu0 %463 }
 0x7ac   :  { %1819 = vrcp.f32 %v464_v44 }
 0x7b2   :  { %v1820_v33 = vpop.eup %1819 }
 0x7b3   :  { %v466_v45 = vmul.f32 %v1820_v33, %v1816_v25  ;;  %v658_v46 = vpop.xlane.xlu1 %657 }
 0x7b4   :  { %1821 = vrcp.f32 %v658_v46 }
 0x7b5   :  { %1667 = vmatmul.msk.f32.vlgmr.msra.gmra.mxu1 %vm172_vm1, %v466_v45 }
 0x7b6   :  { %1684 = vmatpush.xpose.msk.msra.mxu1 %vm172_vm1, %v2239_v42 }
 0x7ba   :  { %v1822_v47 = vpop.eup %1821  ;;  %1685 = vmatpush.xpose.msk.msra.mxu1 %vm172_vm1, %v2244_v43 }
 0x7bb   :  { %v660_v48 = vmul.f32 %v1822_v47, %v1818_v36 }
 0x7bd   :  { %1673 = vmatmul.msk.f32.vlgmr.msrb.gmra.mxu1 %vm172_vm1, %v660_v48 }
 0x7be   :  { %v914_v49 = vpop.permute.xlu0 %913 }
 0x7bf   :  { %1687 = vmatpush.xpose.msk.msrb.mxu1 %vm172_vm1, %v914_v49 }
 0x7c3   :  { %v781_v51 = vpop.f32.mrf.mxu2 }
 0x7c4   :  { %v2258_v52 = vadd.f32 %v2255_v4, %v781_v51 }
 0x7c6   :  { %909 = vrot.lane.b32.xlu2 %v2258_v52, %s2027_s18  ;;  %1686 = vmatmul.msk.f32.vlgmr.msra.gmra.mxu1 %vm172_vm1, %v2258_v52 }
 0x7cb   :  { %v912_v53 = vpop.permute.xlu1 %911 }
 0x7cc   :  { %1688 = vmatpush.xpose.msk.msrb.mxu1 %vm172_vm1, %v912_v53 }
 0x7d0   :  { %1000 = vmatpush.msra.mxu1 %v858_v6 }
 0x7d2   :  { %1001 = vmatpush.msra.mxu1 %v855_v63 }
 0x820   :  { %v910_v57 = vpop.permute.xlu2 %909 }
 0x821   :  { %1689 = vmatmul.msk.f32.vlgmr.msrb.gmra.mxu1 %vm172_vm1, %v910_v57 }
 0x832   :  { %v553_v59 = vpop.f32.mrf.mxu1 }
 0x833   :  { %v554_v60 = vadd.f32 %v553_v59, %v2207_v58 }
 0x835   :  { %v621_v61 = vadd.f32 %v618_v24, %v554_v60 }
 0x83a   :  { %v684_v62 = vpop.f32.mrf.mxu1 }
 0x83b   :  { %v687_v0 = vadd.f32 %v684_v62, %v621_v61  ;;  %v2323_v61 = vpop.f32.mrf.mxu0 }
 0x83d   :  { %v690_v1 = vadd.f32 %v2190_v38, %v687_v0 }
 0x83f   :  { %v692_v2 = vadd.f32 %v690_v1, %v2118_v16 }
 0x841   :  { %v698_v5 = vsel %vm111_vm0, %v692_v2, 0.0 }
 0x842   :  { %699 = vadd.xlane.f32.xlu2 %v698_v5 }
 0x843   :  { %v2274_v3 = vpop.f32.mrf.mxu1 }
 0x844   :  { %v898_v33 = vsel %vm897_vm6, %v2274_v3, -inf }
 0x89e   :  { %v938_v7 = vpop.f32.mrf.mxu1 }
 0x89f   :  { %v941_v58 = vsel %vm897_vm6, %v938_v7, -inf }
 0x8a0   :  { %942 = vmax.xlane.f32.xlu0 %v941_v58 }
 0x8b4   :  { %1745 = vrot.lane.b32.xlu0 %v2277_v8, %s2030_s21 }
 0x8b5   :  { %v700_v16 = vpop.xlane.xlu2 %699 }
 0x8b6   :  { %v709_v38 = vmul.f32 %v2199_v50, %v700_v16 }
 0x8b8   :  { %v711_v9 = vsub.f32 %v692_v2, %v709_v38 }
 0x8ba   :  { %v713_v10 = vmul.f32 %v711_v9, %v711_v9 }
 0x8bc   :  { %1006 = vrot.lane.b32.xlu0 %v2258_v52, %s2029_s20  ;;  %v717_v11 = vsel %vm111_vm0, %v713_v10, 0.0 }
 0x8bd   :  { %718 = vadd.xlane.f32.xlu1 %v717_v11 }
 0x8d6   :  { %1008 = vrot.lane.b32.xlu1 %v2244_v43, %s2029_s20 }
 0x913   :  { %v943_v12 = vpop.xlane.xlu0 %942 }
 0x914   :  { %v944_v13 = vsub.f32 %v938_v7, %v943_v12 }
 0x916   :  { %v945_v14 = vmul.f32 1.442695, %v944_v13 }
 0x918   :  { %1823 = vpow2.f32 %v945_v14 }
 0x91e   :  { %v1824_v15 = vpop.eup %1823 }
 0x91f   :  { %v947_v19 = vsel %vm897_vm6, %v1824_v15, 0.0 }
 0x920   :  { %948 = vadd.xlane.f32.xlu2 %v947_v19 }
 0x926   :  { %v1746_v20 = vpop.permute.xlu0 %1745 }
 0x927   :  { %v1748_v22 = vunpack.i.h.bf16 %v1746_v20  ;;  %v1747_v23 = vunpack.i.l.bf16 %v1746_v20 }
 0x929   :  { %977 = vmatpush.msrb.mxu2 %v1747_v23 }
 0x92b   :  { %978 = vmatpush.msrb.mxu2 %v1748_v22 }
 0x92e   :  { %v1007_v49 = vpop.permute.xlu0 %1006 }
 0x930   :  { %v719_v24 = vpop.xlane.xlu1 %718 }
 0x931   :  { %v721_v25 = vmul.f32 %v719_v24, %v2199_v50 }
 0x933   :  { %v723_v26 = vadd.f32 1e-06, %v721_v25 }
 0x935   :  { %1825 = vrsqrt.f32 %v723_v26  ;;  %vm740_vm8 = vweird.f32 %v723_v26 }
 0x938   :  { %1010 = vrot.lane.b32.xlu2 %v2239_v42, %s2029_s20 }
 0x93b   :  { %v1826_v27 = vpop.eup %1825 }
 0x93c   :  { %v735_v28 = vmul.f32 %v1826_v27, %v723_v26  ;;  %vm741_vm7 = vweird.f32 %v1826_v27 }
 0x93d   :  { %vm742_vm9 = vmor %vm740_vm8, %vm741_vm7 }
 0x93e   :  { %v736_v17 = vmul.f32 %v1826_v27, %v735_v28 }
 0x940   :  { %v737_v31 = vmul.f32 0.5, %v736_v17 }
 0x942   :  { %v738_v34 = vsub.f32 1.5, %v737_v31 }
 0x944   :  { %v739_v35 = vmul.f32 %v1826_v27, %v738_v34 }
 0x946   :  { %v743_v36 = vsel %vm742_vm9, %v1826_v27, %v739_v35 }
 0x947   :  { %v745_v39 = vmul.f32 %v743_v36, %v711_v9 }
 0x949   :  { %v748_v41 = vmul.f32 %v2224_v29, %v745_v39  ;;  %v1009_v29 = vpop.permute.xlu1 %1008 }
 0x94b   :  { %v2297_v44 = vadd.f32 %v2227_v32, %v748_v41  ;;  %v828_v32 = vpop.f32.mrf.mxu3 }
 0x94c   :  { %v2309_v30 = vadd.f32 %v2236_v40, %v828_v32 }
 0x94d   :  { %1675 = vmatmul.msk.f32.gmra.mxu2 %vm111_vm0, %v2297_v44 }
 0x953   :  { %v831_v51 = vpop.f32.mrf.mxu3 }
 0x954   :  { %v832_v53 = vadd.f32 %v2236_v40, %v831_v51 }
 0x956   :  { %1700 = vmatpush.xpose.msk.msra.mxu0 %vm172_vm1, %v832_v53 }
 0x95a   :  { %1701 = vmatpush.xpose.msk.msra.mxu0 %vm172_vm1, %v2309_v30 }
 0x961   :  { %899 = vmax.xlane.f32.xlu2 %v898_v33 }
 0x993   :  { %v949_v45 = vpop.xlane.xlu2 %948 }
 0x994   :  { %1827 = vrcp.f32 %v949_v45 }
 0x99a   :  { %v1828_v46 = vpop.eup %1827 }
 0x99b   :  { %v951_v47 = vmul.f32 %v1828_v46, %v1824_v15  ;;  %v1011_v48 = vpop.permute.xlu2 %1010 }
 0x99c   :  { %1692 = vmatpush.xpose.msk.msra.mxu2 %vm172_vm1, %v1011_v48 }
 0x99d   :  { %1690 = vmatmul.msk.f32.vlgmr.msrb.gmra.mxu2 %vm897_vm6, %v951_v47 }
 0x9a0   :  { %1693 = vmatpush.xpose.msk.msra.mxu2 %vm172_vm1, %v1009_v29 }
 0x9a5   :  { %1694 = vmatmul.msk.f32.vlgmr.msra.gmra.mxu2 %vm172_vm1, %v1007_v49 }
 0x9d0   :  { %v784_v54 = vpop.f32.mrf.mxu2 }
 0x9d1   :  { %v2315_v55 = vadd.f32 %v2255_v4, %v784_v54  ;;  %v2329_v4 = vpop.f32.mrf.mxu0 }
 0x9d2   :  { %v2333_v62 = vpack.i.bf16 %v2323_v61, %v2329_v4 }
 0x9d3   :  { %1702 = vmatmul.msk.f32.vlgmr.msra.gmra.mxu0 %vm172_vm1, %v2315_v55 }
 0x9d4   :  { %v900_v56 = vpop.xlane.xlu2 %899 }
 0x9d5   :  { %v901_v57 = vsub.f32 %v2274_v3, %v900_v56 }
 0x9d7   :  { %v902_v59 = vmul.f32 1.442695, %v901_v57 }
 0x9d9   :  { %1829 = vpow2.f32 %v902_v59 }
 0x9df   :  { %v1830_v60 = vpop.eup %1829 }
 0x9e0   :  { %v904_v40 = vsel %vm897_vm6, %v1830_v60, 0.0 }
 0x9e1   :  { %905 = vadd.xlane.f32.xlu1 %v904_v40 }
 0x9fa   :  { %1194 = vrot.lane.b32.xlu1 %v2309_v30, %s2027_s18 }
 0xa02   :  { %1081 = vrot.lane.b32.xlu1 %v2244_v43, %s2034_s25 }
 0xa0a   :  { %1079 = vrot.lane.b32.xlu1 %v2258_v52, %s2034_s25 }
 0xa12   :  { %1755 = vrot.lane.b32.xlu1 %v2333_v62, %s2030_s21 }
 0xa1a   :  { %1366 = vrot.lane.b32.xlu1 %v832_v53, %s2034_s25 }
 0xa20   :  { %v2338_v0 = vpop.f32.mrf.mxu2 }
 0xa22   :  { %1364 = vrot.lane.b32.xlu1 %v2309_v30, %s2034_s25 }
 0xa28   :  { %v1035_v43 = vpop.f32.mrf.mxu2 }
 0xa29   :  { %v1038_v1 = vsel %vm897_vm6, %v1035_v43, -inf }
 0xa2a   :  { %1293 = vrot.lane.b32.xlu1 %v832_v53, %s2029_s20  ;;  %1039 = vmax.xlane.f32.xlu0 %v1038_v1 }
 0xa32   :  { %1289 = vrot.lane.b32.xlu1 %v2315_v55, %s2029_s20 }
 0xa3e   :  { %1750 = vrot.lane.b32.xlu0 %v2277_v8, %s2031_s22 }
 0xa46   :  { %1192 = vrot.lane.b32.xlu0 %v2315_v55, %s2027_s18 }
 0xa4e   :  { %1083 = vrot.lane.b32.xlu0 %v2239_v42, %s2034_s25 }
 0xa50   :  { %v1178_v33 = vpop.f32.mrf.mxu0 }
 0xa51   :  { %v1181_v45 = vsel %vm897_vm6, %v1178_v33, -inf }
 0xa54   :  { %v906_v52 = vpop.xlane.xlu1 %905 }
 0xa55   :  { %1831 = vrcp.f32 %v906_v52 }
 0xa5b   :  { %v1832_v2 = vpop.eup %1831 }
 0xa5c   :  { %v908_v5 = vmul.f32 %v1832_v2, %v1830_v60 }
 0xa5e   :  { %1691 = vmatmul.msk.f32.vlgmr.msra.gmra.mxu1 %vm897_vm6, %v908_v5 }
 0xa6c   :  { %v1195_v63 = vpop.permute.xlu1 %1194 }
 0xa74   :  { %v1082_v6 = vpop.permute.xlu1 %1081 }
 0xa7c   :  { %v1080_v3 = vpop.permute.xlu1 %1079 }
 0xa84   :  { %v1756_v7 = vpop.permute.xlu1 %1755 }
 0xa85   :  { %v1757_v20 = vunpack.i.l.bf16 %v1756_v7  ;;  %v1758_v21 = vunpack.i.h.bf16 %v1756_v7 }
 0xa8c   :  { %v1367_v58 = vpop.permute.xlu1 %1366 }
 0xa94   :  { %v1365_v16 = vpop.permute.xlu1 %1364 }
 0xa9c   :  { %v1294_v38 = vpop.permute.xlu1 %1293 }
 0xa9d   :  { %v1040_v9 = vpop.xlane.xlu0 %1039  ;;  %1708 = vmatpush.xpose.msk.msrb.mxu0 %vm172_vm1, %v1294_v38 }
 0xa9e   :  { %v1041_v10 = vsub.f32 %v1035_v43, %v1040_v9 }
 0xaa0   :  { %v1042_v11 = vmul.f32 1.442695, %v1041_v10 }
 0xaa2   :  { %1833 = vpow2.f32 %v1042_v11 }
 0xaa4   :  { %v1290_v35 = vpop.permute.xlu1 %1289 }
 0xaa8   :  { %v1834_v42 = vpop.eup %1833 }
 0xaa9   :  { %v1044_v12 = vsel %vm897_vm6, %v1834_v42, 0.0 }
 0xaaa   :  { %1045 = vadd.xlane.f32.xlu2 %v1044_v12 }
 0xab0   :  { %v1751_v13 = vpop.permute.xlu0 %1750 }
 0xab1   :  { %v1752_v14 = vunpack.i.l.bf16 %v1751_v13  ;;  %v1753_v15 = vunpack.i.h.bf16 %v1751_v13 }
 0xab3   :  { %1072 = vmatpush.msrb.mxu1 %v1752_v14 }
 0xab5   :  { %1073 = vmatpush.msrb.mxu1 %v1753_v15 }
 0xab8   :  { %v1193_v18 = vpop.permute.xlu0 %1192 }
 0xac0   :  { %v1084_v19 = vpop.permute.xlu0 %1083 }
 0xac1   :  { %1696 = vmatpush.xpose.msk.msrb.mxu2 %vm172_vm1, %v1084_v19 }
 0xac2   :  { %1196 = vrot.lane.b32.xlu2 %v832_v53, %s2027_s18 }
 0xac5   :  { %1697 = vmatpush.xpose.msk.msrb.mxu2 %vm172_vm1, %v1082_v6 }
 0xac8   :  { %1698 = vmatmul.msk.f32.vlgmr.msrb.gmra.mxu2 %vm172_vm1, %v1080_v3 }
 0xac9   :  { %1260 = vmatpush.msra.mxu2 %v1757_v20 }
 0xacb   :  { %1261 = vmatpush.msra.mxu2 %v1758_v21 }
 0xacd   :  { %1712 = vmatpush.xpose.msk.msrb.mxu2 %vm172_vm1, %v1367_v58 }
 0xad1   :  { %1713 = vmatpush.xpose.msk.msrb.mxu2 %vm172_vm1, %v1365_v16 }
 0xadb   :  { %v2366_v28 = vpop.f32.mrf.mxu1 }
 0xb1d   :  { %v1046_v22 = vpop.xlane.xlu2 %1045 }
 0xb1e   :  { %1835 = vrcp.f32 %v1046_v22 }
 0xb24   :  { %v1836_v23 = vpop.eup %1835 }
 0xb25   :  { %v1048_v24 = vmul.f32 %v1836_v23, %v1834_v42  ;;  %v1197_v25 = vpop.permute.xlu2 %1196 }
 0xb26   :  { %1703 = vmatpush.xpose.msk.msra.mxu1 %vm172_vm1, %v1197_v25 }
 0xb27   :  { %1695 = vmatmul.msk.f32.vlgmr.msrb.gmra.mxu1 %vm897_vm6, %v1048_v24 }
 0xb2a   :  { %1704 = vmatpush.xpose.msk.msra.mxu1 %vm172_vm1, %v1195_v63 }
 0xb2f   :  { %1705 = vmatmul.msk.f32.vlgmr.msra.gmra.mxu1 %vm172_vm1, %v1193_v18 }
 0xb4b   :  { %v1108_v26 = vpop.f32.mrf.mxu2 }
 0xb4c   :  { %v1111_v27 = vsel %vm897_vm6, %v1108_v26, -inf }
 0xb4d   :  { %1112 = vmax.xlane.f32.xlu1 %v1111_v27 }
 0xba4   :  { %v2368_v17 = vpop.f32.mrf.mxu1 }
 0xbac   :  { %v1221_v31 = vpop.f32.mrf.mxu1 }
 0xbad   :  { %v1224_v34 = vsel %vm897_vm6, %v1221_v31, -inf }
 0xbae   :  { %1225 = vmax.xlane.f32.xlu2 %v1224_v34 }
 0xbc0   :  { %v1113_v36 = vpop.xlane.xlu1 %1112 }
 0xbc1   :  { %v1114_v39 = vsub.f32 %v1108_v26, %v1113_v36  ;;  %v1004_v36 = vadd.f32 %v2366_v28, %v2338_v0 }
 0xbc3   :  { %v1115_v41 = vmul.f32 1.442695, %v1114_v39  ;;  %v1078_v39 = vadd.f32 %v2368_v17, %v1004_v36 }
 0xbc5   :  { %1837 = vpow2.f32 %v1115_v41  ;;  %v1780_v41 = vld [vmem:[#allocation10 + $0x4] ss:$0 sm:$0xff] }
 0xbc6   :  { %1362 = vrot.lane.b32.xlu2 %v2315_v55, %s2034_s25 }
 0xbcb   :  { %v1838_v46 = vpop.eup %1837 }
 0xbcc   :  { %v1117_v47 = vsel %vm897_vm6, %v1838_v46, 0.0 }
 0xbef   :  { %1182 = vmax.xlane.f32.xlu2 %v1181_v45 }
 0xbf7   :  { %1118 = vadd.xlane.f32.xlu2 %v1117_v47 }
 0xc21   :  { %v1226_v48 = vpop.xlane.xlu2 %1225 }
 0xc22   :  { %v1227_v29 = vsub.f32 %v1221_v31, %v1226_v48 }
 0xc24   :  { %v1228_v32 = vmul.f32 1.442695, %v1227_v29 }
 0xc26   :  { %1839 = vpow2.f32 %v1228_v32 }
 0xc29   :  { %v1363_v56 = vpop.permute.xlu2 %1362 }
 0xc2c   :  { %v1840_v49 = vpop.eup %1839 }
 0xc2d   :  { %v1230_v51 = vsel %vm897_vm6, %v1840_v49, 0.0 }
 0xc2e   :  { %1231 = vadd.xlane.f32.xlu0 %v1230_v51 }
 0xc42   :  { %1291 = vrot.lane.b32.xlu0 %v2309_v30, %s2029_s20 }
 0xc62   :  { %v1183_v59 = vpop.xlane.xlu2 %1182 }
 0xc63   :  { %v1184_v60 = vsub.f32 %v1178_v33, %v1183_v59 }
 0xc65   :  { %v1185_v43 = vmul.f32 1.442695, %v1184_v60  ;;  %v1495_v60 = vld [vmem:[#allocation7 + $0xb8] sm:$0xff] }
 0xc6a   :  { %v1119_v12 = vpop.xlane.xlu2 %1118 }
 0xca1   :  { %v1232_v53 = vpop.xlane.xlu0 %1231 }
 0xca2   :  { %1841 = vrcp.f32 %v1232_v53 }
 0xca3   :  { %1843 = vpow2.f32 %v1185_v43  ;;  %v1493_v43 = vld [vmem:[#allocation7 + $0x58] sm:$0xff] }
 0xca8   :  { %v1842_v54 = vpop.eup %1841 }
 0xca9   :  { %v1234_v55 = vmul.f32 %v1842_v54, %v1840_v49  ;;  %v1844_v5 = vpop.eup %1843 }
 0xcaa   :  { %v1187_v63 = vsel %vm897_vm6, %v1844_v5, 0.0 }
 0xcab   :  { %1706 = vmatmul.msk.f32.vlgmr.msra.gmra.mxu2 %vm897_vm6, %v1234_v55 }
 0xcb3   :  { %1714 = vmatmul.msk.f32.vlgmr.msrb.gmra.mxu2 %vm172_vm1, %v1363_v56 }
 0xcb4   :  { %v1292_v57 = vpop.permute.xlu0 %1291 }
 0xcb5   :  { %1709 = vmatpush.xpose.msk.msrb.mxu0 %vm172_vm1, %v1292_v57 }
 0xcb8   :  { %1710 = vmatmul.msk.f32.vlgmr.msrb.gmra.mxu0 %vm172_vm1, %v1290_v35  ;;  %vm1539_vm1 = vcmask 523264  }
 0xcb9   :  { %1516 = vmatpush.msra.mxu0 %v1495_v60 }
 0xd2e   :  { %v2382_v40 = vpop.f32.mrf.mxu2 }
 0xd35   :  { %v1318_v30 = vpop.f32.mrf.mxu0 }
 0xd36   :  { %v1391_v1 = vpop.f32.mrf.mxu2  ;;  %v1321_v52 = vsel %vm897_vm6, %v1318_v30, -inf }
 0xd37   :  { %1322 = vmax.xlane.f32.xlu1 %v1321_v52  ;;  %v1394_v2 = vsel %vm897_vm6, %v1391_v1, -inf }
 0xd38   :  { %1395 = vmax.xlane.f32.xlu0 %v1394_v2 }
 0xd40   :  { %1188 = vadd.xlane.f32.xlu0 %v1187_v63 }
 0xd50   :  { %1760 = vrot.lane.b32.xlu1 %v2277_v8, %s2033_s24 }
 0xdaa   :  { %v1323_v6 = vpop.xlane.xlu1 %1322 }
 0xdab   :  { %v1324_v3 = vsub.f32 %v1318_v30, %v1323_v6  ;;  %v1396_v7 = vpop.xlane.xlu0 %1395  ;;  %v1492_v30 = vld [vmem:[#allocation7 + $0x28] sm:$0xff] }
 0xdac   :  { %v1397_v58 = vsub.f32 %v1391_v1, %v1396_v7 }
 0xdad   :  { %v1325_v16 = vmul.f32 1.442695, %v1324_v3 }
 0xdae   :  { %v1398_v38 = vmul.f32 1.442695, %v1397_v58 }
 0xdaf   :  { %1845 = vpow2.f32 %v1325_v16 }
 0xdb0   :  { %1847 = vpow2.f32 %v1398_v38 }
 0xdb1   :  { %1849 = vrcp.f32 %v1119_v12 }
 0xdb3   :  { %v1189_v13 = vpop.xlane.xlu0 %1188 }
 0xdb4   :  { %1851 = vrcp.f32 %v1189_v13  ;;  %v1782_v13 = vld [vmem:[#allocation10 + $0xa] ss:$0 sm:$0xff] }
 0xdb5   :  { %v1846_v9 = vpop.eup %1845 }
 0xdb6   :  { %v1848_v10 = vpop.eup %1847  ;;  %v1327_v11 = vsel %vm897_vm6, %v1846_v9, 0.0 }
 0xdb7   :  { %1328 = vadd.xlane.f32.xlu0 %v1327_v11  ;;  %v1400_v42 = vsel %vm897_vm6, %v1848_v10, 0.0  ;;  %v1850_v14 = vpop.eup %1849  ;;  %v1781_v11 = vld [vmem:[#allocation10 + $0x9] ss:$0 sm:$0xff] }
 0xdb8   :  { %1401 = vadd.xlane.f32.xlu2 %v1400_v42  ;;  %v1121_v19 = vmul.f32 %v1850_v14, %v1838_v46 }
 0xdba   :  { %v1852_v20 = vpop.eup %1851 }
 0xdbb   :  { %v1191_v21 = vmul.f32 %v1852_v20, %v1844_v5  ;;  %v1533_v20 = vld [vmem:[#allocation8 + $0x20] sm:$0xff] }
 0xdc2   :  { %v1761_v8 = vpop.permute.xlu1 %1760 }
 0xdc3   :  { %v1762_v15 = vunpack.i.l.bf16 %v1761_v8  ;;  %v1763_v18 = vunpack.i.h.bf16 %v1761_v8 }
 0xdc5   :  { %1145 = vmatpush.msrb.mxu3 %v1762_v15  ;;  %v1536_v15 = vld [vmem:[#allocation8 + $0x38] sm:$0xff] }
 0xdc7   :  { %1146 = vmatpush.msrb.mxu3 %v1763_v18  ;;  %v1535_v18 = vld [vmem:[#allocation8 + $0x30] sm:$0xff] }
 0xdc8   :  { %1699 = vmatmul.msk.f32.vlgmr.msrb.gmra.mxu3 %vm897_vm6, %v1121_v19  ;;  %v1534_v19 = vld [vmem:[#allocation8 + $0x28] sm:$0xff] }
 0xdc9   :  { %1283 = vmatpush.msra.mxu3 %v2329_v4 }
 0xdcb   :  { %1284 = vmatpush.msra.mxu3 %v2323_v61  ;;  %1770 = vrot.lane.b32.xlu0 %v2333_v62, %s2031_s22 }
 0xdd0   :  { %1765 = vrot.lane.b32.xlu2 %v2333_v62, %s2033_s24  ;;  %1707 = vmatmul.msk.f32.vlgmr.msra.gmra.mxu3 %vm897_vm6, %v1191_v21  ;;  %v1532_v21 = vld [vmem:[#allocation8 + $0x18] sm:$0xff] }
 0xe2a   :  { %v1329_v26 = vpop.xlane.xlu0 %1328 }
 0xe2b   :  { %v1402_v22 = vpop.xlane.xlu2 %1401 }
 0xe2c   :  { %1853 = vrcp.f32 %v1402_v22 }
 0xe2d   :  { %1855 = vrcp.f32 %v1329_v26  ;;  %v1530_v26 = vld [vmem:[#allocation8 + $0x8] sm:$0xff] }
 0xe32   :  { %v1854_v24 = vpop.eup %1853 }
 0xe33   :  { %v1766_v23 = vpop.permute.xlu2 %1765  ;;  %v1404_v4 = vmul.f32 %v1854_v24, %v1848_v10  ;;  %v1856_v31 = vpop.eup %1855 }
 0xe34   :  { %v1767_v25 = vunpack.i.l.bf16 %v1766_v23  ;;  %v1768_v27 = vunpack.i.h.bf16 %v1766_v23  ;;  %v1331_v62 = vmul.f32 %v1856_v31, %v1846_v9 }
 0xe36   :  { %1428 = vmatpush.msrb.mxu3 %v1767_v25  ;;  %v1531_v25 = vld [vmem:[#allocation8 + $0x10] sm:$0xff] }
 0xe38   :  { %1429 = vmatpush.msrb.mxu3 %v1768_v27  ;;  %v1529_v27 = vld [vmem:[#allocation8] sm:$0xff] }
 0xe39   :  { %1715 = vmatmul.msk.f32.vlgmr.msrb.gmra.mxu3 %vm897_vm6, %v1404_v4 }
 0xe3d   :  { %v1771_v61 = vpop.permute.xlu0 %1770 }
 0xe3e   :  { %v1772_v34 = vunpack.i.l.bf16 %v1771_v61  ;;  %v1773_v35 = vunpack.i.h.bf16 %v1771_v61 }
 0xe40   :  { %1355 = vmatpush.msrb.mxu1 %v1772_v34 }
 0xe42   :  { %1356 = vmatpush.msrb.mxu1 %v1773_v35 }
 0xe43   :  { %1711 = vmatmul.msk.f32.vlgmr.msrb.gmra.mxu1 %vm897_vm6, %v1331_v62 }
 0xe44   :  { %1554 = vmatpush.msra.mxu1 %v1536_v15 }
 0xe46   :  { %1555 = vmatpush.msra.mxu1 %v1535_v18 }
 0xe48   :  { %1556 = vmatpush.msra.mxu1 %v1534_v19 }
 0xe4a   :  { %1557 = vmatpush.msra.mxu1 %v1533_v20 }
 0xe4b   :  { %v1148_v33 = vpop.f32.mrf.mxu3 }
 0xe4c   :  { %v1151_v45 = vadd.f32 %v1148_v33, %v1078_v39  ;;  %1558 = vmatpush.msra.mxu1 %v1532_v21 }
 0xe4e   :  { %v1436_v46 = vadd.f32 %v1780_v41, %v1151_v45  ;;  %1559 = vmatpush.msra.mxu1 %v1531_v25  ;;  %v1783_v45 = vld [vmem:[#allocation10 + $0x5] ss:$0 sm:$0xff] }
 0xe50   :  { %v1438_v47 = vadd.f32 %v1436_v46, %v2231_v37  ;;  %1560 = vmatpush.msra.mxu1 %v1530_v26 }
 0xe52   :  { %v1442_v48 = vsel %vm111_vm0, %v1438_v47, 0.0  ;;  %1561 = vmatpush.msra.mxu1 %v1529_v27 }
 0xe53   :  { %1443 = vadd.xlane.f32.xlu1 %v1442_v48  ;;  %v1286_v29 = vpop.f32.mrf.mxu3 }
 0xe54   :  { %v1287_v32 = vadd.f32 %v1286_v29, %v2382_v40  ;;  %v1494_v40 = vld [vmem:[#allocation7 + $0x88] sm:$0xff] }
 0xe55   :  { %1517 = vmatpush.msra.mxu0 %v1494_v40 }
 0xe57   :  { %1518 = vmatpush.msra.mxu0 %v1493_v43 }
 0xe59   :  { %1519 = vmatpush.msra.mxu0 %v1492_v30 }
 0xebc   :  { %v1431_v53 = vpop.f32.mrf.mxu3 }
 0xec0   :  { %v1358_v49 = vpop.f32.mrf.mxu1 }
 0xec1   :  { %v1361_v51 = vadd.f32 %v1358_v49, %v1287_v32 }
 0xec3   :  { %v1434_v54 = vadd.f32 %v1431_v53, %v1361_v51  ;;  %v1784_v51 = vld [vmem:[#allocation10 + $0x6] ss:$0 sm:$0xff] }
 0xec5   :  { %v1437_v55 = vadd.f32 %v1780_v41, %v1434_v54 }
 0xec6   :  { %v1444_v0 = vpop.xlane.xlu1 %1443 }
 0xec7   :  { %v1448_v28 = vmul.f32 %v1444_v0, %v2199_v50  ;;  %v1439_v17 = vadd.f32 %v1437_v55, %v2297_v44 }
 0xec9   :  { %v1450_v56 = vsub.f32 %v1438_v47, %v1448_v28  ;;  %v1445_v57 = vsel %vm111_vm0, %v1439_v17, 0.0 }
 0xeca   :  { %1446 = vadd.xlane.f32.xlu2 %v1445_v57 }
 0xecb   :  { %v1452_v37 = vmul.f32 %v1450_v56, %v1450_v56 }
 0xecd   :  { %v1454_v59 = vsel %vm111_vm0, %v1452_v37, 0.0 }
 0xece   :  { %1455 = vadd.xlane.f32.xlu0 %v1454_v59 }
 0xf3d   :  { %v1447_v1 = vpop.xlane.xlu2 %1446 }
 0xf3e   :  { %v1449_v52 = vmul.f32 %v1447_v1, %v2199_v50 }
 0xf40   :  { %v1451_v44 = vsub.f32 %v1439_v17, %v1449_v52 }
 0xf41   :  { %v1456_v2 = vpop.xlane.xlu0 %1455 }
 0xf42   :  { %v1460_v5 = vmul.f32 %v1456_v2, %v2199_v50  ;;  %v1453_v63 = vmul.f32 %v1451_v44, %v1451_v44 }
 0xf44   :  { %v1462_v6 = vadd.f32 1e-06, %v1460_v5  ;;  %v1457_v3 = vsel %vm111_vm0, %v1453_v63, 0.0 }
 0xf45   :  { %1458 = vadd.xlane.f32.xlu1 %v1457_v3 }
 0xf46   :  { %1857 = vrsqrt.f32 %v1462_v6  ;;  %vm1470_vm11 = vweird.f32 %v1462_v6 }
 0xf4c   :  { %v1858_v7 = vpop.eup %1857 }
 0xf4d   :  { %v1465_v58 = vmul.f32 %v1858_v7, %v1462_v6  ;;  %vm1471_vm10 = vweird.f32 %v1858_v7 }
 0xf4e   :  { %vm1472_vm12 = vmor %vm1470_vm11, %vm1471_vm10 }
 0xf4f   :  { %v1466_v16 = vmul.f32 %v1858_v7, %v1465_v58 }
 0xf51   :  { %v1467_v38 = vmul.f32 0.5, %v1466_v16 }
 0xf53   :  { %v1468_v9 = vsub.f32 1.5, %v1467_v38 }
 0xf55   :  { %v1469_v10 = vmul.f32 %v1858_v7, %v1468_v9 }
 0xf57   :  { %v1473_v42 = vsel %vm1472_vm12, %v1858_v7, %v1469_v10  ;;  %v1785_v10 = vld [vmem:[#allocation10 + $0xb] ss:$0 sm:$0xff] }
 0xf58   :  { %v1484_v12 = vmul.f32 %v1473_v42, %v1450_v56 }
 0xf5a   :  { %v1487_v8 = vmul.f32 %v1781_v11, %v1484_v12  ;;  %v1786_v12 = vld [vmem:[#allocation10 + $0xc] ss:$0 sm:$0xff] }
 0xf5c   :  { %v1490_v14 = vadd.f32 %v1782_v13, %v1487_v8 }
 0xf5e   :  { %1716 = vmatmul.msk.f32.vlgmr.msra.gmra.mxu0 %vm111_vm0, %v1490_v14 }
 0xfb8   :  { %v1459_v22 = vpop.xlane.xlu1 %1458 }
 0xfb9   :  { %v1461_v23 = vmul.f32 %v1459_v22, %v2199_v50 }
 0xfbb   :  { %v1463_v24 = vadd.f32 1e-06, %v1461_v23 }
 0xfbd   :  { %1859 = vrsqrt.f32 %v1463_v24  ;;  %vm1480_vm14 = vweird.f32 %v1463_v24 }
 0xfc3   :  { %v1860_v4 = vpop.eup %1859 }
 0xfc4   :  { %v1475_v61 = vmul.f32 %v1860_v4, %v1463_v24  ;;  %vm1481_vm13 = vweird.f32 %v1860_v4 }
 0xfc5   :  { %vm1482_vm15 = vmor %vm1480_vm14, %vm1481_vm13 }
 0xfc6   :  { %v1476_v31 = vmul.f32 %v1860_v4, %v1475_v61 }
 0xfc8   :  { %v1477_v34 = vmul.f32 0.5, %v1476_v31 }
 0xfca   :  { %v1478_v35 = vsub.f32 1.5, %v1477_v34 }
 0xfcc   :  { %v1479_v62 = vmul.f32 %v1860_v4, %v1478_v35 }
 0xfce   :  { %v1483_v36 = vsel %vm1482_vm15, %v1860_v4, %v1479_v62 }
 0xfcf   :  { %v1485_v39 = vmul.f32 %v1483_v36, %v1451_v44 }
 0xfd1   :  { %v1488_v41 = vmul.f32 %v1781_v11, %v1485_v39 }
 0xfd3   :  { %v1491_v33 = vadd.f32 %v1782_v13, %v1488_v41 }
 0xfd5   :  { %1717 = vmatmul.msk.f32.gmra.mxu0 %vm111_vm0, %v1491_v33 }
 0xfdb   :  { %v1521_v46 = vpop.f32.mrf.mxu0 }
 0xfdc   :  { %v1522_v47 = vadd.f32 %v1783_v45, %v1521_v46 }
 0xfde   :  { %v1527_v48 = vmax.f32 %v1522_v47, 0.0 }
 0xfe0   :  { %1718 = vmatmul.msk.f32.vlgmr.msra.gmra.mxu1 %vm1539_vm1, %v1527_v48 }
0x1052   :  { %v1524_v29 = vpop.f32.mrf.mxu0 }
0x1053   :  { %v1525_v32 = vadd.f32 %v1783_v45, %v1524_v29 }
0x1055   :  { %v1528_v49 = vmax.f32 %v1525_v32, 0.0 }
0x1057   :  { %1719 = vmatmul.msk.f32.gmra.mxu1 %vm1539_vm1, %v1528_v49 }
0x105d   :  { %v1563_v53 = vpop.f32.mrf.mxu1 }
0x105e   :  { %v1564_v54 = vadd.f32 %v1784_v51, %v1563_v53 }
0x1060   :  { %v1569_v55 = vadd.f32 %v1564_v54, %v1490_v14 }
0x1062   :  { %v1573_v0 = vsel %vm111_vm0, %v1569_v55, 0.0 }
0x1063   :  { %1574 = vadd.xlane.f32.xlu1 %v1573_v0 }
0x10d4   :  { %v1566_v28 = vpop.f32.mrf.mxu1 }
0x10d5   :  { %v1567_v17 = vadd.f32 %v1784_v51, %v1566_v28 }
0x10d6   :  { %v1575_v56 = vpop.xlane.xlu1 %1574 }
0x10d7   :  { %v1579_v57 = vmul.f32 %v1575_v56, %v2199_v50  ;;  %v1570_v37 = vadd.f32 %v1567_v17, %v1491_v33 }
0x10d9   :  { %v1581_v59 = vsub.f32 %v1569_v55, %v1579_v57  ;;  %v1576_v60 = vsel %vm111_vm0, %v1570_v37, 0.0 }
0x10da   :  { %1577 = vadd.xlane.f32.xlu2 %v1576_v60 }
0x10db   :  { %v1583_v40 = vmul.f32 %v1581_v59, %v1581_v59 }
0x10dd   :  { %v1585_v43 = vsel %vm111_vm0, %v1583_v40, 0.0 }
0x10de   :  { %1586 = vadd.xlane.f32.xlu0 %v1585_v43 }
0x114d   :  { %v1578_v30 = vpop.xlane.xlu2 %1577 }
0x114e   :  { %v1580_v1 = vmul.f32 %v1578_v30, %v2199_v50 }
0x1150   :  { %v1582_v52 = vsub.f32 %v1570_v37, %v1580_v1 }
0x1151   :  { %v1587_v44 = vpop.xlane.xlu0 %1586 }
0x1152   :  { %v1591_v2 = vmul.f32 %v1587_v44, %v2199_v50  ;;  %v1584_v5 = vmul.f32 %v1582_v52, %v1582_v52 }
0x1154   :  { %v1593_v63 = vadd.f32 1e-06, %v1591_v2  ;;  %v1588_v6 = vsel %vm111_vm0, %v1584_v5, 0.0 }
0x1155   :  { %1589 = vadd.xlane.f32.xlu1 %v1588_v6 }
0x1156   :  { %1861 = vrsqrt.f32 %v1593_v63  ;;  %vm1601_vm3 = vweird.f32 %v1593_v63 }
0x115c   :  { %v1862_v3 = vpop.eup %1861 }
0x115d   :  { %v1596_v7 = vmul.f32 %v1862_v3, %v1593_v63  ;;  %vm1602_vm2 = vweird.f32 %v1862_v3 }
0x115e   :  { %vm1603_vm4 = vmor %vm1601_vm3, %vm1602_vm2 }
0x115f   :  { %v1597_v58 = vmul.f32 %v1862_v3, %v1596_v7 }
0x1161   :  { %v1598_v16 = vmul.f32 0.5, %v1597_v58 }
0x1163   :  { %v1599_v38 = vsub.f32 1.5, %v1598_v16 }
0x1165   :  { %v1600_v9 = vmul.f32 %v1862_v3, %v1599_v38 }
0x1167   :  { %v1604_v11 = vsel %vm1603_vm4, %v1862_v3, %v1600_v9 }
0x1168   :  { %v1615_v42 = vmul.f32 %v1604_v11, %v1581_v59 }
0x116a   :  { %v1618_v13 = vmul.f32 %v1785_v10, %v1615_v42 }
0x116c   :  { %v1621_v8 = vadd.f32 %v1786_v12, %v1618_v13 }
0x116e   :  { %1623 = vst.msk [vmem:[#allocation11] sm:$0xff] %vm111_vm0, %v1621_v8 }
0x11c8   :  { %v1590_v14 = vpop.xlane.xlu1 %1589 }
0x11c9   :  { %v1592_v15 = vmul.f32 %v1590_v14, %v2199_v50 }
0x11cb   :  { %v1594_v18 = vadd.f32 1e-06, %v1592_v15 }
0x11cd   :  { %1863 = vrsqrt.f32 %v1594_v18  ;;  %vm1611_vm6 = vweird.f32 %v1594_v18 }
0x11d3   :  { %v1864_v19 = vpop.eup %1863 }
0x11d4   :  { %v1606_v20 = vmul.f32 %v1864_v19, %v1594_v18  ;;  %vm1612_vm5 = vweird.f32 %v1864_v19 }
0x11d5   :  { %vm1613_vm7 = vmor %vm1611_vm6, %vm1612_vm5 }
0x11d6   :  { %v1607_v21 = vmul.f32 %v1864_v19, %v1606_v20 }
0x11d8   :  { %v1608_v22 = vmul.f32 0.5, %v1607_v21 }
0x11da   :  { %v1609_v23 = vsub.f32 1.5, %v1608_v22 }
0x11dc   :  { %v1610_v24 = vmul.f32 %v1864_v19, %v1609_v23 }
0x11de   :  { %v1614_v25 = vsel %vm1613_vm7, %v1864_v19, %v1610_v24 }
0x11df   :  { %v1616_v26 = vmul.f32 %v1614_v25, %v1582_v52 }
0x11e1   :  { %v1619_v50 = vmul.f32 %v1785_v10, %v1616_v26 }
0x11e3   :  { %v1622_v27 = vadd.f32 %v1786_v12, %v1619_v50 }
0x11e5   :  { %1624 = vst.msk [vmem:[#allocation11 + $0x8] sm:$0xff] %vm111_vm0, %v1622_v27 }
0x11e6   :  { %1637 = dma.vmem_to_hbm [thread:$0]  %s1630_s29, 256, %s1632_s1, [#allocation4], %s2018_s26, %s2018_s26, %s2019_s27  }
0x11e7   :  { %2015 = dma.done.wait [#allocation4], 256  }
0x11e8   :  { %2016 = vsyncadd [#allocation4], 4294967040 }
0x11e9   :  { %1642 = vsyncpa [#allocation3], 1 }
0x11ea   :  { %1643 = vsyncpa [#allocation6], 1 }
0x11eb   :  { %1644 = vsyncpa [#allocation9], 1 }
0x11ec   :  { %1645 = vsyncpa [#allocation4], 1 }

</bundles_post_ra>
